<compile_context>
chip_gen: v6e
topology: v6e:2x2x1
jax: 0.10.0
libtpu: 0.0.40
codegen_flags: <defaults>
</compile_context>

<pallas_src>
import functools

import jax
import jax.numpy as jnp
from jax.experimental import pallas as pl
from jax.experimental.pallas import tpu as pltpu


# ----------------------------------------------------------------------------
# Fused GATv2 layer kernel (+ ReLU, + residual, + optional final Linear)
# ----------------------------------------------------------------------------
def gatv2_layer_kernel(*refs, heads, ch, residual, final):
    """One row tile of target nodes of a dense GATv2Conv (PyG: edge_dim=1,
    add_self_loops, concat heads), fused with ResGnn's ReLU / residual add and,
    for the last layer, the final Linear.

    Inputs (in order):
      xl_ref  : [N, HC]  bf16  lin_l projection of all sources (NO bias) — MXU agg operand
      xlt_ref : [HC, N]  f32   same projection, transposed — score source term
      xr_ref  : [tm, HC] f32   lin_r projection of this target tile (+ bl + br folded in)
      mb_ref  : [tm, N]  bf16  additive mask bias: 0 on edges, -1e30 elsewhere
      ea_ref  : [tm, N]  bf16  dense scalar edge attribute (0.01 on self loops)
      par_ref : [3, HC]  f32   rows: lin_edge weight | att vector | (conv bias + bl)
      res_ref : [tm, HC] bf16  (only if residual) previous activations
      lw_ref  : [HC, O]  bf16  (only if final) final Linear weight
      lb_ref  : [1, O]   f32   (only if final) final Linear bias
    Output:
      out_ref : [tm, HC] bf16  (intermediate layer)  or  [tm, O] f32 (final layer)
    """
    refs = list(refs)
    xl_ref = refs.pop(0)
    xlt_ref = refs.pop(0)
    xr_ref = refs.pop(0)
    mb_ref = refs.pop(0)
    ea_ref = refs.pop(0)
    par_ref = refs.pop(0)
    res_ref = refs.pop(0) if residual else None
    if final:
        lw_ref = refs.pop(0)
        lb_ref = refs.pop(0)
    out_ref = refs.pop(0)

    f32, bf16 = jnp.float32, jnp.bfloat16

    # Streamed tiles are bf16 in HBM/VMEM; cast once and reuse across channels.
    ea = ea_ref[...].astype(f32)                                  # [tm, N]
    mb = mb_ref[...].astype(f32)                                  # [tm, N]
    xr = xr_ref[...]                                              # [tm, HC]
    xlt = xlt_ref[...]                                            # [HC, N]
    xl_all = xl_ref[...]                                          # [N, HC] bf16
    par = par_ref[...]                                            # [3, HC]

    head_out = []
    for h in range(heads):
        # ---- attention logits via per-channel accumulation (no [HC,tm,N] slab;
        #      only a few [tm, N] planes are live at any point) ----------------
        acc = mb                                   # start from the mask bias
        for c in range(ch):
            k = h * ch + c
            # s[i, j] = x_r[i, k] + x_l[j, k] + W_edge[k] * ea[i, j]
            s = xr[:, k:k + 1] + xlt[k:k + 1, :] + par[0:1, k:k + 1] * ea
            s = jnp.maximum(s, 0.2 * s)            # leaky_relu(0.2): one max op
            acc = acc + par[1:2, k:k + 1] * s      # += att[k] * leaky(s)

        # ---- masked softmax over incoming edges (self loop guarantees a valid
        #      entry per row, so the -1e30 mask bias is safe) -------------------
        m = jnp.max(acc, axis=-1, keepdims=True)                  # [tm, 1]
        p = jnp.exp(acc - m)                    # masked entries underflow to 0
        inv = pl.reciprocal(jnp.sum(p, axis=-1, keepdims=True), approx=True)

        # ---- aggregation: normalisation pushed past the matmul ---------------
        agg = jnp.dot(p.astype(bf16), xl_all[:, h * ch:(h + 1) * ch],
                      preferred_element_type=f32)                 # [tm, C]
        head_out.append(agg * inv)

    out = jnp.concatenate(head_out, axis=-1)                      # [tm, HC]

    # ---- epilogue: (conv bias + folded lin_l bias) + ReLU (+ residual) -------
    out = jnp.maximum(out + par[2:3, :], 0.0)
    if residual:
        out = out + res_ref[...].astype(f32)
    if final:
        # Fused final Linear (avoids an extra [N, HC] HBM round trip).
        out = jnp.dot(out.astype(bf16), lw_ref[...],
                      preferred_element_type=f32) + lb_ref[...]
    # NOTE: output lanes (HC=32 / O=4) are < 128 -> masked stores; bf16 output
    # halves the store count for intermediate layers. A 128-lane repacked view
    # would need an in-kernel relayout, so it is intentionally skipped.
    out_ref[...] = out.astype(out_ref.dtype)


# ----------------------------------------------------------------------------
# Pallas wrapper
# ----------------------------------------------------------------------------
def _pick_row_tile(n):
    if n <= 128:
        return n
    assert n % 128 == 0, "TODO(synk): pad node count to a multiple of 128"
    return 128


def gatv2_layer(x, maskb, ea, p, *, heads, ch, residual=None, final_lin=None):
    n = x.shape[0]
    hc = heads * ch
    tm = _pick_row_tile(n)
    n_tiles = n // tm
    f32, bf16 = jnp.float32, jnp.bfloat16

    # ---- per-layer projections hoisted OUT of the row-tile grid (computed once
    #      per layer, not once per tile; plain XLA matmuls per the review) ------
    xb = x.astype(bf16)
    xl = jnp.dot(xb, p['wl'].astype(bf16), preferred_element_type=f32)   # [N,HC]
    xr = (jnp.dot(xb, p['wr'].astype(bf16), preferred_element_type=f32)
          + p['bl'] + p['br'])          # both linear biases folded into the score
    xl_t = xl.T                         # [HC, N] — single transpose per layer
    xl_b = xl.astype(bf16)              # aggregation operand (bias folded to epilogue)

    # Packed tiny per-channel params: lin_edge weight | att vector | epilogue bias.
    par = jnp.concatenate([p['we'], p['att'], p['bias'] + p['bl']], axis=0)  # [3,HC]

    kernel = functools.partial(gatv2_layer_kernel, heads=heads, ch=ch,
                               residual=residual is not None,
                               final=final_lin is not None)

    # TODO(synk): invariant full-block inputs below are still double-buffered by
    # the default pipeline (sub-MiB waste); pl.Buffered(1) / resident placement
    # would reclaim it.
    def full(shape):
        return pl.BlockSpec(shape, lambda i: (0, 0))

    def row_tiled(cols):
        return pl.BlockSpec((tm, cols), lambda i: (i, 0))

    in_specs = [
        full((n, hc)),        # xl (bf16, aggregation operand)
        full((hc, n)),        # xl^T (f32, score source term)
        row_tiled(hc),        # xr tile (f32, score target term, biases folded)
        row_tiled(n),         # mask bias tile (bf16)
        row_tiled(n),         # edge-attr tile (bf16)
        full((3, hc)),        # packed we / att / epilogue bias
    ]
    args = [xl_b, xl_t, xr, maskb, ea, par]

    if residual is not None:
        in_specs.append(row_tiled(hc))
        args.append(residual)

    if final_lin is not None:
        lw, lb = final_lin
        out_ch = lw.shape[1]
        in_specs += [full((hc, out_ch)), full((1, out_ch))]
        args += [lw.astype(bf16), lb]
        out_shape = jax.ShapeDtypeStruct((n, out_ch), f32)
        out_spec = row_tiled(out_ch)
    else:
        # Inter-layer activations stored in bf16 (halves HBM writeback/re-read).
        out_shape = jax.ShapeDtypeStruct((n, hc), bf16)
        out_spec = row_tiled(hc)

    # TODO(synk): for very large N add a source-axis (j) grid dimension with an
    # online softmax (flash-style m/l/acc) so the working set stays bounded on
    # v7x (64 MiB/TC); current design tiles target rows only.
    return pl.pallas_call(
        kernel,
        out_shape=out_shape,
        grid=(n_tiles,),
        in_specs=in_specs,
        out_specs=out_spec,
        compiler_params=pltpu.CompilerParams(
            dimension_semantics=("parallel",),          # megacore over row tiles
            # v7x-safe cap; raise toward ~96-112 MiB on 128-MiB parts (v5e/v6e).
            vmem_limit_bytes=48 * 1024 * 1024),
    )(*args)


# ----------------------------------------------------------------------------
# ResGnn forward
# ----------------------------------------------------------------------------
def res_gnn_forward(x, edge_index, edge_attr, params, *, heads, hidden):
    x = x.astype(jnp.float32)
    edge_attr = edge_attr.astype(jnp.float32)
    n = x.shape[0]

    # Glue: densify the graph. adj[i, j] = edge j -> i (PyG: row0=src j, row1=dst i)
    src, dst = edge_index[0], edge_index[1]
    adj = jnp.zeros((n, n), jnp.float32).at[dst, src].set(1.0)
    ea = jnp.zeros((n, n), jnp.float32).at[dst, src].set(edge_attr[:, 0])
    eye = jnp.eye(n, dtype=jnp.float32)
    adj = adj * (1.0 - eye) + eye             # remove_self_loops + add_self_loops
    ea = ea * (1.0 - eye) + 0.01 * eye        # fill_value = 0.01
    # Additive softmax mask bias precomputed ONCE (not per tile); streamed bf16.
    maskb = ((adj - 1.0) * 1e30).astype(jnp.bfloat16)
    ea_b = ea.astype(jnp.bfloat16)

    h = x
    num_layers = len(params['convs'])
    for i, p in enumerate(params['convs']):
        is_last = i == num_layers - 1
        h = gatv2_layer(
            h, maskb, ea_b, p, heads=heads, ch=hidden,
            residual=None if i == 0 else h,                   # fused in-kernel
            final_lin=(params['lin_w'], params['lin_b']) if is_last else None)
    return h


# ----------------------------------------------------------------------------
# Deterministic parameter init (synthetic; shapes match GATv2Conv/Linear)
# ----------------------------------------------------------------------------
def init_params(key, in_channels, out_channels, num_layers, hidden, heads):
    params = {'convs': []}
    fin = in_channels
    hc = heads * hidden
    for _ in range(num_layers):
        key, k0, k1, k2, k3 = jax.random.split(key, 5)
        params['convs'].append({
            'wl':   jax.random.normal(k0, (fin, hc), jnp.float32) * 0.1,
            'bl':   jnp.zeros((1, hc), jnp.float32),
            'wr':   jax.random.normal(k1, (fin, hc), jnp.float32) * 0.1,
            'br':   jnp.zeros((1, hc), jnp.float32),
            # lin_edge weight / att vector flattened to [1, H*C] (index h*C + c,
            # matching the column ordering of wl/wr).
            'we':   jax.random.normal(k2, (1, hc), jnp.float32) * 0.1,
            'att':  jax.random.normal(k3, (1, hc), jnp.float32) * 0.1,
            'bias': jnp.zeros((1, hc), jnp.float32),
        })
        fin = hc
    key, kl = jax.random.split(key)
    params['lin_w'] = jax.random.normal(kl, (hc, out_channels), jnp.float32) * 0.1
    params['lin_b'] = jnp.zeros((1, out_channels), jnp.float32)
    return params


# ----------------------------------------------------------------------------
if __name__ == "__main__":
    N, IN_CH, OUT_CH = 16, 8, 4
    NUM_LAYERS, HIDDEN, HEADS = 2, 16, 2

    key = jax.random.PRNGKey(0)
    kx, ke, kp = jax.random.split(key, 3)

    x = jax.random.normal(kx, (N, IN_CH), jnp.float32)

    # Deterministic edge list: ring + skip-3 edges (no self loops, no duplicates).
    idx = jnp.arange(N)
    src = jnp.concatenate([idx, idx])
    dst = jnp.concatenate([(idx + 1) % N, (idx + 3) % N])
    edge_index = jnp.stack([src, dst]).astype(jnp.int32)       # [2, E]
    E = edge_index.shape[1]
    edge_attr = jax.random.normal(ke, (E, 1), jnp.float32)     # edge_dim = 1

    params = init_params(kp, IN_CH, OUT_CH, NUM_LAYERS, HIDDEN, HEADS)

    out = res_gnn_forward(x, edge_index, edge_attr, params,
                          heads=HEADS, hidden=HIDDEN)
    jax.block_until_ready(out)
    assert out.shape == (N, OUT_CH) and out.dtype == jnp.float32
    assert bool(jnp.all(jnp.isfinite(out)))

    # TODO(synk): get_attention() (per-edge attention weight extraction) is not
    # implemented; only forward() was required.
    print("KERNEL_OK")
</pallas_src>

<mosaic_0001>
module attributes {stable_mosaic.version = 11 : i64} {
  func.func @gatv2_layer_kernel(%arg0: i32, %arg1: memref<16x32xbf16, #tpu.memory_space<vmem>>, %arg2: memref<32x16xf32, #tpu.memory_space<vmem>>, %arg3: memref<16x32xf32, #tpu.memory_space<vmem>>, %arg4: memref<16x16xbf16, #tpu.memory_space<vmem>>, %arg5: memref<16x16xbf16, #tpu.memory_space<vmem>>, %arg6: memref<3x32xf32, #tpu.memory_space<vmem>>, %arg7: memref<16x32xbf16, #tpu.memory_space<vmem>>) attributes {dimension_semantics = [#tpu.dimension_semantics<parallel>], iteration_bounds = array<i64: 1>, scalar_prefetch = 0 : i64, scratch_operands = 0 : i64, tpu.core_type = #tpu.core_type<tc>, window_params = [{pipeline_mode = #tpu.pipeline_mode<synchronous>, transform_indices = @transform_0, window_bounds = array<i64: 16, 32>}, {pipeline_mode = #tpu.pipeline_mode<synchronous>, transform_indices = @transform_1, window_bounds = array<i64: 32, 16>}, {transform_indices = @transform_2, window_bounds = array<i64: 16, 32>}, {transform_indices = @transform_3, window_bounds = array<i64: 16, 16>}, {transform_indices = @transform_4, window_bounds = array<i64: 16, 16>}, {pipeline_mode = #tpu.pipeline_mode<synchronous>, transform_indices = @transform_5, window_bounds = array<i64: 3, 32>}, {transform_indices = @transform_6, window_bounds = array<i64: 16, 32>}]} {
    %c0 = arith.constant 0 : index
    %c0_0 = arith.constant 0 : index
    %0 = vector.load %arg5[%c0, %c0_0] : memref<16x16xbf16, #tpu.memory_space<vmem>>, vector<16x16xbf16>
    %1 = arith.extf %0 : vector<16x16xbf16> to vector<16x16xf32>
    %c0_1 = arith.constant 0 : index
    %c0_2 = arith.constant 0 : index
    %2 = vector.load %arg4[%c0_1, %c0_2] : memref<16x16xbf16, #tpu.memory_space<vmem>>, vector<16x16xbf16>
    %3 = arith.extf %2 : vector<16x16xbf16> to vector<16x16xf32>
    %c0_3 = arith.constant 0 : index
    %c0_4 = arith.constant 0 : index
    %4 = vector.load %arg3[%c0_3, %c0_4] : memref<16x32xf32, #tpu.memory_space<vmem>>, vector<16x32xf32>
    %c0_5 = arith.constant 0 : index
    %c0_6 = arith.constant 0 : index
    %5 = vector.load %arg2[%c0_5, %c0_6] : memref<32x16xf32, #tpu.memory_space<vmem>>, vector<32x16xf32>
    %c0_7 = arith.constant 0 : index
    %c0_8 = arith.constant 0 : index
    %6 = vector.load %arg1[%c0_7, %c0_8] : memref<16x32xbf16, #tpu.memory_space<vmem>>, vector<16x32xbf16>
    %c0_9 = arith.constant 0 : index
    %c0_10 = arith.constant 0 : index
    %7 = vector.load %arg6[%c0_9, %c0_10] : memref<3x32xf32, #tpu.memory_space<vmem>>, vector<3x32xf32>
    %8 = vector.extract_strided_slice %4 {offsets = [0, 0], sizes = [16, 1], strides = [1, 1]} : vector<16x32xf32> to vector<16x1xf32>
    %9 = vector.extract_strided_slice %5 {offsets = [0, 0], sizes = [1, 16], strides = [1, 1]} : vector<32x16xf32> to vector<1x16xf32>
    %10 = vector.broadcast %8 : vector<16x1xf32> to vector<16x16xf32>
    %11 = vector.broadcast %9 : vector<1x16xf32> to vector<16x16xf32>
    %12 = arith.addf %10, %11 : vector<16x16xf32>
    %13 = vector.extract_strided_slice %7 {offsets = [0, 0], sizes = [1, 1], strides = [1, 1]} : vector<3x32xf32> to vector<1x1xf32>
    %14 = vector.broadcast %13 : vector<1x1xf32> to vector<16x16xf32>
    %15 = arith.mulf %14, %1 : vector<16x16xf32>
    %16 = arith.addf %12, %15 : vector<16x16xf32>
    %cst = arith.constant 2.000000e-01 : f32
    %17 = vector.broadcast %cst : f32 to vector<16x16xf32>
    %18 = arith.mulf %17, %16 : vector<16x16xf32>
    %19 = arith.maximumf %16, %18 : vector<16x16xf32>
    %20 = vector.extract_strided_slice %7 {offsets = [1, 0], sizes = [1, 1], strides = [1, 1]} : vector<3x32xf32> to vector<1x1xf32>
    %21 = vector.broadcast %20 : vector<1x1xf32> to vector<16x16xf32>
    %22 = arith.mulf %21, %19 : vector<16x16xf32>
    %23 = arith.addf %3, %22 : vector<16x16xf32>
    %24 = vector.extract_strided_slice %4 {offsets = [0, 1], sizes = [16, 1], strides = [1, 1]} : vector<16x32xf32> to vector<16x1xf32>
    %25 = vector.extract_strided_slice %5 {offsets = [1, 0], sizes = [1, 16], strides = [1, 1]} : vector<32x16xf32> to vector<1x16xf32>
    %26 = vector.broadcast %24 : vector<16x1xf32> to vector<16x16xf32>
    %27 = vector.broadcast %25 : vector<1x16xf32> to vector<16x16xf32>
    %28 = arith.addf %26, %27 : vector<16x16xf32>
    %29 = vector.extract_strided_slice %7 {offsets = [0, 1], sizes = [1, 1], strides = [1, 1]} : vector<3x32xf32> to vector<1x1xf32>
    %30 = vector.broadcast %29 : vector<1x1xf32> to vector<16x16xf32>
    %31 = arith.mulf %30, %1 : vector<16x16xf32>
    %32 = arith.addf %28, %31 : vector<16x16xf32>
    %cst_11 = arith.constant 2.000000e-01 : f32
    %33 = vector.broadcast %cst_11 : f32 to vector<16x16xf32>
    %34 = arith.mulf %33, %32 : vector<16x16xf32>
    %35 = arith.maximumf %32, %34 : vector<16x16xf32>
    %36 = vector.extract_strided_slice %7 {offsets = [1, 1], sizes = [1, 1], strides = [1, 1]} : vector<3x32xf32> to vector<1x1xf32>
    %37 = vector.broadcast %36 : vector<1x1xf32> to vector<16x16xf32>
    %38 = arith.mulf %37, %35 : vector<16x16xf32>
    %39 = arith.addf %23, %38 : vector<16x16xf32>
    %40 = vector.extract_strided_slice %4 {offsets = [0, 2], sizes = [16, 1], strides = [1, 1]} : vector<16x32xf32> to vector<16x1xf32>
    %41 = vector.extract_strided_slice %5 {offsets = [2, 0], sizes = [1, 16], strides = [1, 1]} : vector<32x16xf32> to vector<1x16xf32>
    %42 = vector.broadcast %40 : vector<16x1xf32> to vector<16x16xf32>
    %43 = vector.broadcast %41 : vector<1x16xf32> to vector<16x16xf32>
    %44 = arith.addf %42, %43 : vector<16x16xf32>
    %45 = vector.extract_strided_slice %7 {offsets = [0, 2], sizes = [1, 1], strides = [1, 1]} : vector<3x32xf32> to vector<1x1xf32>
    %46 = vector.broadcast %45 : vector<1x1xf32> to vector<16x16xf32>
    %47 = arith.mulf %46, %1 : vector<16x16xf32>
    %48 = arith.addf %44, %47 : vector<16x16xf32>
    %cst_12 = arith.constant 2.000000e-01 : f32
    %49 = vector.broadcast %cst_12 : f32 to vector<16x16xf32>
    %50 = arith.mulf %49, %48 : vector<16x16xf32>
    %51 = arith.maximumf %48, %50 : vector<16x16xf32>
    %52 = vector.extract_strided_slice %7 {offsets = [1, 2], sizes = [1, 1], strides = [1, 1]} : vector<3x32xf32> to vector<1x1xf32>
    %53 = vector.broadcast %52 : vector<1x1xf32> to vector<16x16xf32>
    %54 = arith.mulf %53, %51 : vector<16x16xf32>
    %55 = arith.addf %39, %54 : vector<16x16xf32>
    %56 = vector.extract_strided_slice %4 {offsets = [0, 3], sizes = [16, 1], strides = [1, 1]} : vector<16x32xf32> to vector<16x1xf32>
    %57 = vector.extract_strided_slice %5 {offsets = [3, 0], sizes = [1, 16], strides = [1, 1]} : vector<32x16xf32> to vector<1x16xf32>
    %58 = vector.broadcast %56 : vector<16x1xf32> to vector<16x16xf32>
    %59 = vector.broadcast %57 : vector<1x16xf32> to vector<16x16xf32>
    %60 = arith.addf %58, %59 : vector<16x16xf32>
    %61 = vector.extract_strided_slice %7 {offsets = [0, 3], sizes = [1, 1], strides = [1, 1]} : vector<3x32xf32> to vector<1x1xf32>
    %62 = vector.broadcast %61 : vector<1x1xf32> to vector<16x16xf32>
    %63 = arith.mulf %62, %1 : vector<16x16xf32>
    %64 = arith.addf %60, %63 : vector<16x16xf32>
    %cst_13 = arith.constant 2.000000e-01 : f32
    %65 = vector.broadcast %cst_13 : f32 to vector<16x16xf32>
    %66 = arith.mulf %65, %64 : vector<16x16xf32>
    %67 = arith.maximumf %64, %66 : vector<16x16xf32>
    %68 = vector.extract_strided_slice %7 {offsets = [1, 3], sizes = [1, 1], strides = [1, 1]} : vector<3x32xf32> to vector<1x1xf32>
    %69 = vector.broadcast %68 : vector<1x1xf32> to vector<16x16xf32>
    %70 = arith.mulf %69, %67 : vector<16x16xf32>
    %71 = arith.addf %55, %70 : vector<16x16xf32>
    %72 = vector.extract_strided_slice %4 {offsets = [0, 4], sizes = [16, 1], strides = [1, 1]} : vector<16x32xf32> to vector<16x1xf32>
    %73 = vector.extract_strided_slice %5 {offsets = [4, 0], sizes = [1, 16], strides = [1, 1]} : vector<32x16xf32> to vector<1x16xf32>
    %74 = vector.broadcast %72 : vector<16x1xf32> to vector<16x16xf32>
    %75 = vector.broadcast %73 : vector<1x16xf32> to vector<16x16xf32>
    %76 = arith.addf %74, %75 : vector<16x16xf32>
    %77 = vector.extract_strided_slice %7 {offsets = [0, 4], sizes = [1, 1], strides = [1, 1]} : vector<3x32xf32> to vector<1x1xf32>
    %78 = vector.broadcast %77 : vector<1x1xf32> to vector<16x16xf32>
    %79 = arith.mulf %78, %1 : vector<16x16xf32>
    %80 = arith.addf %76, %79 : vector<16x16xf32>
    %cst_14 = arith.constant 2.000000e-01 : f32
    %81 = vector.broadcast %cst_14 : f32 to vector<16x16xf32>
    %82 = arith.mulf %81, %80 : vector<16x16xf32>
    %83 = arith.maximumf %80, %82 : vector<16x16xf32>
    %84 = vector.extract_strided_slice %7 {offsets = [1, 4], sizes = [1, 1], strides = [1, 1]} : vector<3x32xf32> to vector<1x1xf32>
    %85 = vector.broadcast %84 : vector<1x1xf32> to vector<16x16xf32>
    %86 = arith.mulf %85, %83 : vector<16x16xf32>
    %87 = arith.addf %71, %86 : vector<16x16xf32>
    %88 = vector.extract_strided_slice %4 {offsets = [0, 5], sizes = [16, 1], strides = [1, 1]} : vector<16x32xf32> to vector<16x1xf32>
    %89 = vector.extract_strided_slice %5 {offsets = [5, 0], sizes = [1, 16], strides = [1, 1]} : vector<32x16xf32> to vector<1x16xf32>
    %90 = vector.broadcast %88 : vector<16x1xf32> to vector<16x16xf32>
    %91 = vector.broadcast %89 : vector<1x16xf32> to vector<16x16xf32>
    %92 = arith.addf %90, %91 : vector<16x16xf32>
    %93 = vector.extract_strided_slice %7 {offsets = [0, 5], sizes = [1, 1], strides = [1, 1]} : vector<3x32xf32> to vector<1x1xf32>
    %94 = vector.broadcast %93 : vector<1x1xf32> to vector<16x16xf32>
    %95 = arith.mulf %94, %1 : vector<16x16xf32>
    %96 = arith.addf %92, %95 : vector<16x16xf32>
    %cst_15 = arith.constant 2.000000e-01 : f32
    %97 = vector.broadcast %cst_15 : f32 to vector<16x16xf32>
    %98 = arith.mulf %97, %96 : vector<16x16xf32>
    %99 = arith.maximumf %96, %98 : vector<16x16xf32>
    %100 = vector.extract_strided_slice %7 {offsets = [1, 5], sizes = [1, 1], strides = [1, 1]} : vector<3x32xf32> to vector<1x1xf32>
    %101 = vector.broadcast %100 : vector<1x1xf32> to vector<16x16xf32>
    %102 = arith.mulf %101, %99 : vector<16x16xf32>
    %103 = arith.addf %87, %102 : vector<16x16xf32>
    %104 = vector.extract_strided_slice %4 {offsets = [0, 6], sizes = [16, 1], strides = [1, 1]} : vector<16x32xf32> to vector<16x1xf32>
    %105 = vector.extract_strided_slice %5 {offsets = [6, 0], sizes = [1, 16], strides = [1, 1]} : vector<32x16xf32> to vector<1x16xf32>
    %106 = vector.broadcast %104 : vector<16x1xf32> to vector<16x16xf32>
    %107 = vector.broadcast %105 : vector<1x16xf32> to vector<16x16xf32>
    %108 = arith.addf %106, %107 : vector<16x16xf32>
    %109 = vector.extract_strided_slice %7 {offsets = [0, 6], sizes = [1, 1], strides = [1, 1]} : vector<3x32xf32> to vector<1x1xf32>
    %110 = vector.broadcast %109 : vector<1x1xf32> to vector<16x16xf32>
    %111 = arith.mulf %110, %1 : vector<16x16xf32>
    %112 = arith.addf %108, %111 : vector<16x16xf32>
    %cst_16 = arith.constant 2.000000e-01 : f32
    %113 = vector.broadcast %cst_16 : f32 to vector<16x16xf32>
    %114 = arith.mulf %113, %112 : vector<16x16xf32>
    %115 = arith.maximumf %112, %114 : vector<16x16xf32>
    %116 = vector.extract_strided_slice %7 {offsets = [1, 6], sizes = [1, 1], strides = [1, 1]} : vector<3x32xf32> to vector<1x1xf32>
    %117 = vector.broadcast %116 : vector<1x1xf32> to vector<16x16xf32>
    %118 = arith.mulf %117, %115 : vector<16x16xf32>
    %119 = arith.addf %103, %118 : vector<16x16xf32>
    %120 = vector.extract_strided_slice %4 {offsets = [0, 7], sizes = [16, 1], strides = [1, 1]} : vector<16x32xf32> to vector<16x1xf32>
    %121 = vector.extract_strided_slice %5 {offsets = [7, 0], sizes = [1, 16], strides = [1, 1]} : vector<32x16xf32> to vector<1x16xf32>
    %122 = vector.broadcast %120 : vector<16x1xf32> to vector<16x16xf32>
    %123 = vector.broadcast %121 : vector<1x16xf32> to vector<16x16xf32>
    %124 = arith.addf %122, %123 : vector<16x16xf32>
    %125 = vector.extract_strided_slice %7 {offsets = [0, 7], sizes = [1, 1], strides = [1, 1]} : vector<3x32xf32> to vector<1x1xf32>
    %126 = vector.broadcast %125 : vector<1x1xf32> to vector<16x16xf32>
    %127 = arith.mulf %126, %1 : vector<16x16xf32>
    %128 = arith.addf %124, %127 : vector<16x16xf32>
    %cst_17 = arith.constant 2.000000e-01 : f32
    %129 = vector.broadcast %cst_17 : f32 to vector<16x16xf32>
    %130 = arith.mulf %129, %128 : vector<16x16xf32>
    %131 = arith.maximumf %128, %130 : vector<16x16xf32>
    %132 = vector.extract_strided_slice %7 {offsets = [1, 7], sizes = [1, 1], strides = [1, 1]} : vector<3x32xf32> to vector<1x1xf32>
    %133 = vector.broadcast %132 : vector<1x1xf32> to vector<16x16xf32>
    %134 = arith.mulf %133, %131 : vector<16x16xf32>
    %135 = arith.addf %119, %134 : vector<16x16xf32>
    %136 = vector.extract_strided_slice %4 {offsets = [0, 8], sizes = [16, 1], strides = [1, 1]} : vector<16x32xf32> to vector<16x1xf32>
    %137 = vector.extract_strided_slice %5 {offsets = [8, 0], sizes = [1, 16], strides = [1, 1]} : vector<32x16xf32> to vector<1x16xf32>
    %138 = vector.broadcast %136 : vector<16x1xf32> to vector<16x16xf32>
    %139 = vector.broadcast %137 : vector<1x16xf32> to vector<16x16xf32>
    %140 = arith.addf %138, %139 : vector<16x16xf32>
    %141 = vector.extract_strided_slice %7 {offsets = [0, 8], sizes = [1, 1], strides = [1, 1]} : vector<3x32xf32> to vector<1x1xf32>
    %142 = vector.broadcast %141 : vector<1x1xf32> to vector<16x16xf32>
    %143 = arith.mulf %142, %1 : vector<16x16xf32>
    %144 = arith.addf %140, %143 : vector<16x16xf32>
    %cst_18 = arith.constant 2.000000e-01 : f32
    %145 = vector.broadcast %cst_18 : f32 to vector<16x16xf32>
    %146 = arith.mulf %145, %144 : vector<16x16xf32>
    %147 = arith.maximumf %144, %146 : vector<16x16xf32>
    %148 = vector.extract_strided_slice %7 {offsets = [1, 8], sizes = [1, 1], strides = [1, 1]} : vector<3x32xf32> to vector<1x1xf32>
    %149 = vector.broadcast %148 : vector<1x1xf32> to vector<16x16xf32>
    %150 = arith.mulf %149, %147 : vector<16x16xf32>
    %151 = arith.addf %135, %150 : vector<16x16xf32>
    %152 = vector.extract_strided_slice %4 {offsets = [0, 9], sizes = [16, 1], strides = [1, 1]} : vector<16x32xf32> to vector<16x1xf32>
    %153 = vector.extract_strided_slice %5 {offsets = [9, 0], sizes = [1, 16], strides = [1, 1]} : vector<32x16xf32> to vector<1x16xf32>
    %154 = vector.broadcast %152 : vector<16x1xf32> to vector<16x16xf32>
    %155 = vector.broadcast %153 : vector<1x16xf32> to vector<16x16xf32>
    %156 = arith.addf %154, %155 : vector<16x16xf32>
    %157 = vector.extract_strided_slice %7 {offsets = [0, 9], sizes = [1, 1], strides = [1, 1]} : vector<3x32xf32> to vector<1x1xf32>
    %158 = vector.broadcast %157 : vector<1x1xf32> to vector<16x16xf32>
    %159 = arith.mulf %158, %1 : vector<16x16xf32>
    %160 = arith.addf %156, %159 : vector<16x16xf32>
    %cst_19 = arith.constant 2.000000e-01 : f32
    %161 = vector.broadcast %cst_19 : f32 to vector<16x16xf32>
    %162 = arith.mulf %161, %160 : vector<16x16xf32>
    %163 = arith.maximumf %160, %162 : vector<16x16xf32>
    %164 = vector.extract_strided_slice %7 {offsets = [1, 9], sizes = [1, 1], strides = [1, 1]} : vector<3x32xf32> to vector<1x1xf32>
    %165 = vector.broadcast %164 : vector<1x1xf32> to vector<16x16xf32>
    %166 = arith.mulf %165, %163 : vector<16x16xf32>
    %167 = arith.addf %151, %166 : vector<16x16xf32>
    %168 = vector.extract_strided_slice %4 {offsets = [0, 10], sizes = [16, 1], strides = [1, 1]} : vector<16x32xf32> to vector<16x1xf32>
    %169 = vector.extract_strided_slice %5 {offsets = [10, 0], sizes = [1, 16], strides = [1, 1]} : vector<32x16xf32> to vector<1x16xf32>
    %170 = vector.broadcast %168 : vector<16x1xf32> to vector<16x16xf32>
    %171 = vector.broadcast %169 : vector<1x16xf32> to vector<16x16xf32>
    %172 = arith.addf %170, %171 : vector<16x16xf32>
    %173 = vector.extract_strided_slice %7 {offsets = [0, 10], sizes = [1, 1], strides = [1, 1]} : vector<3x32xf32> to vector<1x1xf32>
    %174 = vector.broadcast %173 : vector<1x1xf32> to vector<16x16xf32>
    %175 = arith.mulf %174, %1 : vector<16x16xf32>
    %176 = arith.addf %172, %175 : vector<16x16xf32>
    %cst_20 = arith.constant 2.000000e-01 : f32
    %177 = vector.broadcast %cst_20 : f32 to vector<16x16xf32>
    %178 = arith.mulf %177, %176 : vector<16x16xf32>
    %179 = arith.maximumf %176, %178 : vector<16x16xf32>
    %180 = vector.extract_strided_slice %7 {offsets = [1, 10], sizes = [1, 1], strides = [1, 1]} : vector<3x32xf32> to vector<1x1xf32>
    %181 = vector.broadcast %180 : vector<1x1xf32> to vector<16x16xf32>
    %182 = arith.mulf %181, %179 : vector<16x16xf32>
    %183 = arith.addf %167, %182 : vector<16x16xf32>
    %184 = vector.extract_strided_slice %4 {offsets = [0, 11], sizes = [16, 1], strides = [1, 1]} : vector<16x32xf32> to vector<16x1xf32>
    %185 = vector.extract_strided_slice %5 {offsets = [11, 0], sizes = [1, 16], strides = [1, 1]} : vector<32x16xf32> to vector<1x16xf32>
    %186 = vector.broadcast %184 : vector<16x1xf32> to vector<16x16xf32>
    %187 = vector.broadcast %185 : vector<1x16xf32> to vector<16x16xf32>
    %188 = arith.addf %186, %187 : vector<16x16xf32>
    %189 = vector.extract_strided_slice %7 {offsets = [0, 11], sizes = [1, 1], strides = [1, 1]} : vector<3x32xf32> to vector<1x1xf32>
    %190 = vector.broadcast %189 : vector<1x1xf32> to vector<16x16xf32>
    %191 = arith.mulf %190, %1 : vector<16x16xf32>
    %192 = arith.addf %188, %191 : vector<16x16xf32>
    %cst_21 = arith.constant 2.000000e-01 : f32
    %193 = vector.broadcast %cst_21 : f32 to vector<16x16xf32>
    %194 = arith.mulf %193, %192 : vector<16x16xf32>
    %195 = arith.maximumf %192, %194 : vector<16x16xf32>
    %196 = vector.extract_strided_slice %7 {offsets = [1, 11], sizes = [1, 1], strides = [1, 1]} : vector<3x32xf32> to vector<1x1xf32>
    %197 = vector.broadcast %196 : vector<1x1xf32> to vector<16x16xf32>
    %198 = arith.mulf %197, %195 : vector<16x16xf32>
    %199 = arith.addf %183, %198 : vector<16x16xf32>
    %200 = vector.extract_strided_slice %4 {offsets = [0, 12], sizes = [16, 1], strides = [1, 1]} : vector<16x32xf32> to vector<16x1xf32>
    %201 = vector.extract_strided_slice %5 {offsets = [12, 0], sizes = [1, 16], strides = [1, 1]} : vector<32x16xf32> to vector<1x16xf32>
    %202 = vector.broadcast %200 : vector<16x1xf32> to vector<16x16xf32>
    %203 = vector.broadcast %201 : vector<1x16xf32> to vector<16x16xf32>
    %204 = arith.addf %202, %203 : vector<16x16xf32>
    %205 = vector.extract_strided_slice %7 {offsets = [0, 12], sizes = [1, 1], strides = [1, 1]} : vector<3x32xf32> to vector<1x1xf32>
    %206 = vector.broadcast %205 : vector<1x1xf32> to vector<16x16xf32>
    %207 = arith.mulf %206, %1 : vector<16x16xf32>
    %208 = arith.addf %204, %207 : vector<16x16xf32>
    %cst_22 = arith.constant 2.000000e-01 : f32
    %209 = vector.broadcast %cst_22 : f32 to vector<16x16xf32>
    %210 = arith.mulf %209, %208 : vector<16x16xf32>
    %211 = arith.maximumf %208, %210 : vector<16x16xf32>
    %212 = vector.extract_strided_slice %7 {offsets = [1, 12], sizes = [1, 1], strides = [1, 1]} : vector<3x32xf32> to vector<1x1xf32>
    %213 = vector.broadcast %212 : vector<1x1xf32> to vector<16x16xf32>
    %214 = arith.mulf %213, %211 : vector<16x16xf32>
    %215 = arith.addf %199, %214 : vector<16x16xf32>
    %216 = vector.extract_strided_slice %4 {offsets = [0, 13], sizes = [16, 1], strides = [1, 1]} : vector<16x32xf32> to vector<16x1xf32>
    %217 = vector.extract_strided_slice %5 {offsets = [13, 0], sizes = [1, 16], strides = [1, 1]} : vector<32x16xf32> to vector<1x16xf32>
    %218 = vector.broadcast %216 : vector<16x1xf32> to vector<16x16xf32>
    %219 = vector.broadcast %217 : vector<1x16xf32> to vector<16x16xf32>
    %220 = arith.addf %218, %219 : vector<16x16xf32>
    %221 = vector.extract_strided_slice %7 {offsets = [0, 13], sizes = [1, 1], strides = [1, 1]} : vector<3x32xf32> to vector<1x1xf32>
    %222 = vector.broadcast %221 : vector<1x1xf32> to vector<16x16xf32>
    %223 = arith.mulf %222, %1 : vector<16x16xf32>
    %224 = arith.addf %220, %223 : vector<16x16xf32>
    %cst_23 = arith.constant 2.000000e-01 : f32
    %225 = vector.broadcast %cst_23 : f32 to vector<16x16xf32>
    %226 = arith.mulf %225, %224 : vector<16x16xf32>
    %227 = arith.maximumf %224, %226 : vector<16x16xf32>
    %228 = vector.extract_strided_slice %7 {offsets = [1, 13], sizes = [1, 1], strides = [1, 1]} : vector<3x32xf32> to vector<1x1xf32>
    %229 = vector.broadcast %228 : vector<1x1xf32> to vector<16x16xf32>
    %230 = arith.mulf %229, %227 : vector<16x16xf32>
    %231 = arith.addf %215, %230 : vector<16x16xf32>
    %232 = vector.extract_strided_slice %4 {offsets = [0, 14], sizes = [16, 1], strides = [1, 1]} : vector<16x32xf32> to vector<16x1xf32>
    %233 = vector.extract_strided_slice %5 {offsets = [14, 0], sizes = [1, 16], strides = [1, 1]} : vector<32x16xf32> to vector<1x16xf32>
    %234 = vector.broadcast %232 : vector<16x1xf32> to vector<16x16xf32>
    %235 = vector.broadcast %233 : vector<1x16xf32> to vector<16x16xf32>
    %236 = arith.addf %234, %235 : vector<16x16xf32>
    %237 = vector.extract_strided_slice %7 {offsets = [0, 14], sizes = [1, 1], strides = [1, 1]} : vector<3x32xf32> to vector<1x1xf32>
    %238 = vector.broadcast %237 : vector<1x1xf32> to vector<16x16xf32>
    %239 = arith.mulf %238, %1 : vector<16x16xf32>
    %240 = arith.addf %236, %239 : vector<16x16xf32>
    %cst_24 = arith.constant 2.000000e-01 : f32
    %241 = vector.broadcast %cst_24 : f32 to vector<16x16xf32>
    %242 = arith.mulf %241, %240 : vector<16x16xf32>
    %243 = arith.maximumf %240, %242 : vector<16x16xf32>
    %244 = vector.extract_strided_slice %7 {offsets = [1, 14], sizes = [1, 1], strides = [1, 1]} : vector<3x32xf32> to vector<1x1xf32>
    %245 = vector.broadcast %244 : vector<1x1xf32> to vector<16x16xf32>
    %246 = arith.mulf %245, %243 : vector<16x16xf32>
    %247 = arith.addf %231, %246 : vector<16x16xf32>
    %248 = vector.extract_strided_slice %4 {offsets = [0, 15], sizes = [16, 1], strides = [1, 1]} : vector<16x32xf32> to vector<16x1xf32>
    %249 = vector.extract_strided_slice %5 {offsets = [15, 0], sizes = [1, 16], strides = [1, 1]} : vector<32x16xf32> to vector<1x16xf32>
    %250 = vector.broadcast %248 : vector<16x1xf32> to vector<16x16xf32>
    %251 = vector.broadcast %249 : vector<1x16xf32> to vector<16x16xf32>
    %252 = arith.addf %250, %251 : vector<16x16xf32>
    %253 = vector.extract_strided_slice %7 {offsets = [0, 15], sizes = [1, 1], strides = [1, 1]} : vector<3x32xf32> to vector<1x1xf32>
    %254 = vector.broadcast %253 : vector<1x1xf32> to vector<16x16xf32>
    %255 = arith.mulf %254, %1 : vector<16x16xf32>
    %256 = arith.addf %252, %255 : vector<16x16xf32>
    %cst_25 = arith.constant 2.000000e-01 : f32
    %257 = vector.broadcast %cst_25 : f32 to vector<16x16xf32>
    %258 = arith.mulf %257, %256 : vector<16x16xf32>
    %259 = arith.maximumf %256, %258 : vector<16x16xf32>
    %260 = vector.extract_strided_slice %7 {offsets = [1, 15], sizes = [1, 1], strides = [1, 1]} : vector<3x32xf32> to vector<1x1xf32>
    %261 = vector.broadcast %260 : vector<1x1xf32> to vector<16x16xf32>
    %262 = arith.mulf %261, %259 : vector<16x16xf32>
    %263 = arith.addf %247, %262 : vector<16x16xf32>
    %cst_26 = arith.constant dense<0xFF800000> : vector<16xf32>
    %264 = vector.multi_reduction <maximumf>, %263, %cst_26 [1] : vector<16x16xf32> to vector<16xf32>
    %265 = vector.shape_cast %264 : vector<16xf32> to vector<16x1xf32>
    %266 = vector.broadcast %265 : vector<16x1xf32> to vector<16x16xf32>
    %267 = arith.subf %263, %266 : vector<16x16xf32>
    %268 = math.exp %267 : vector<16x16xf32>
    %cst_27 = arith.constant dense<0.000000e+00> : vector<16xf32>
    %269 = vector.multi_reduction <add>, %268, %cst_27 [1] : vector<16x16xf32> to vector<16xf32>
    %270 = vector.shape_cast %269 : vector<16xf32> to vector<16x1xf32>
    %271 = tpu.reciprocal %270 {approx = true} : vector<16x1xf32> -> vector<16x1xf32>
    %272 = arith.truncf %268 : vector<16x16xf32> to vector<16x16xbf16>
    %273 = vector.extract_strided_slice %6 {offsets = [0, 0], sizes = [16, 16], strides = [1, 1]} : vector<16x32xbf16> to vector<16x16xbf16>
    %cst_28 = arith.constant dense<0.000000e+00> : vector<16x16xf32>
    %274 = tpu.matmul %272, %273, %cst_28 {dimension_numbers = #tpu.dot_dimension_numbers<[1], [0], [0], [1], [0, 0, 1, 1], [], []>} : vector<16x16xbf16>, vector<16x16xbf16>, vector<16x16xf32> -> vector<16x16xf32>
    %275 = vector.broadcast %271 : vector<16x1xf32> to vector<16x16xf32>
    %276 = arith.mulf %274, %275 : vector<16x16xf32>
    %277 = vector.extract_strided_slice %4 {offsets = [0, 16], sizes = [16, 1], strides = [1, 1]} : vector<16x32xf32> to vector<16x1xf32>
    %278 = vector.extract_strided_slice %5 {offsets = [16, 0], sizes = [1, 16], strides = [1, 1]} : vector<32x16xf32> to vector<1x16xf32>
    %279 = vector.broadcast %277 : vector<16x1xf32> to vector<16x16xf32>
    %280 = vector.broadcast %278 : vector<1x16xf32> to vector<16x16xf32>
    %281 = arith.addf %279, %280 : vector<16x16xf32>
    %282 = vector.extract_strided_slice %7 {offsets = [0, 16], sizes = [1, 1], strides = [1, 1]} : vector<3x32xf32> to vector<1x1xf32>
    %283 = vector.broadcast %282 : vector<1x1xf32> to vector<16x16xf32>
    %284 = arith.mulf %283, %1 : vector<16x16xf32>
    %285 = arith.addf %281, %284 : vector<16x16xf32>
    %cst_29 = arith.constant 2.000000e-01 : f32
    %286 = vector.broadcast %cst_29 : f32 to vector<16x16xf32>
    %287 = arith.mulf %286, %285 : vector<16x16xf32>
    %288 = arith.maximumf %285, %287 : vector<16x16xf32>
    %289 = vector.extract_strided_slice %7 {offsets = [1, 16], sizes = [1, 1], strides = [1, 1]} : vector<3x32xf32> to vector<1x1xf32>
    %290 = vector.broadcast %289 : vector<1x1xf32> to vector<16x16xf32>
    %291 = arith.mulf %290, %288 : vector<16x16xf32>
    %292 = arith.addf %3, %291 : vector<16x16xf32>
    %293 = vector.extract_strided_slice %4 {offsets = [0, 17], sizes = [16, 1], strides = [1, 1]} : vector<16x32xf32> to vector<16x1xf32>
    %294 = vector.extract_strided_slice %5 {offsets = [17, 0], sizes = [1, 16], strides = [1, 1]} : vector<32x16xf32> to vector<1x16xf32>
    %295 = vector.broadcast %293 : vector<16x1xf32> to vector<16x16xf32>
    %296 = vector.broadcast %294 : vector<1x16xf32> to vector<16x16xf32>
    %297 = arith.addf %295, %296 : vector<16x16xf32>
    %298 = vector.extract_strided_slice %7 {offsets = [0, 17], sizes = [1, 1], strides = [1, 1]} : vector<3x32xf32> to vector<1x1xf32>
    %299 = vector.broadcast %298 : vector<1x1xf32> to vector<16x16xf32>
    %300 = arith.mulf %299, %1 : vector<16x16xf32>
    %301 = arith.addf %297, %300 : vector<16x16xf32>
    %cst_30 = arith.constant 2.000000e-01 : f32
    %302 = vector.broadcast %cst_30 : f32 to vector<16x16xf32>
    %303 = arith.mulf %302, %301 : vector<16x16xf32>
    %304 = arith.maximumf %301, %303 : vector<16x16xf32>
    %305 = vector.extract_strided_slice %7 {offsets = [1, 17], sizes = [1, 1], strides = [1, 1]} : vector<3x32xf32> to vector<1x1xf32>
    %306 = vector.broadcast %305 : vector<1x1xf32> to vector<16x16xf32>
    %307 = arith.mulf %306, %304 : vector<16x16xf32>
    %308 = arith.addf %292, %307 : vector<16x16xf32>
    %309 = vector.extract_strided_slice %4 {offsets = [0, 18], sizes = [16, 1], strides = [1, 1]} : vector<16x32xf32> to vector<16x1xf32>
    %310 = vector.extract_strided_slice %5 {offsets = [18, 0], sizes = [1, 16], strides = [1, 1]} : vector<32x16xf32> to vector<1x16xf32>
    %311 = vector.broadcast %309 : vector<16x1xf32> to vector<16x16xf32>
    %312 = vector.broadcast %310 : vector<1x16xf32> to vector<16x16xf32>
    %313 = arith.addf %311, %312 : vector<16x16xf32>
    %314 = vector.extract_strided_slice %7 {offsets = [0, 18], sizes = [1, 1], strides = [1, 1]} : vector<3x32xf32> to vector<1x1xf32>
    %315 = vector.broadcast %314 : vector<1x1xf32> to vector<16x16xf32>
    %316 = arith.mulf %315, %1 : vector<16x16xf32>
    %317 = arith.addf %313, %316 : vector<16x16xf32>
    %cst_31 = arith.constant 2.000000e-01 : f32
    %318 = vector.broadcast %cst_31 : f32 to vector<16x16xf32>
    %319 = arith.mulf %318, %317 : vector<16x16xf32>
    %320 = arith.maximumf %317, %319 : vector<16x16xf32>
    %321 = vector.extract_strided_slice %7 {offsets = [1, 18], sizes = [1, 1], strides = [1, 1]} : vector<3x32xf32> to vector<1x1xf32>
    %322 = vector.broadcast %321 : vector<1x1xf32> to vector<16x16xf32>
    %323 = arith.mulf %322, %320 : vector<16x16xf32>
    %324 = arith.addf %308, %323 : vector<16x16xf32>
    %325 = vector.extract_strided_slice %4 {offsets = [0, 19], sizes = [16, 1], strides = [1, 1]} : vector<16x32xf32> to vector<16x1xf32>
    %326 = vector.extract_strided_slice %5 {offsets = [19, 0], sizes = [1, 16], strides = [1, 1]} : vector<32x16xf32> to vector<1x16xf32>
    %327 = vector.broadcast %325 : vector<16x1xf32> to vector<16x16xf32>
    %328 = vector.broadcast %326 : vector<1x16xf32> to vector<16x16xf32>
    %329 = arith.addf %327, %328 : vector<16x16xf32>
    %330 = vector.extract_strided_slice %7 {offsets = [0, 19], sizes = [1, 1], strides = [1, 1]} : vector<3x32xf32> to vector<1x1xf32>
    %331 = vector.broadcast %330 : vector<1x1xf32> to vector<16x16xf32>
    %332 = arith.mulf %331, %1 : vector<16x16xf32>
    %333 = arith.addf %329, %332 : vector<16x16xf32>
    %cst_32 = arith.constant 2.000000e-01 : f32
    %334 = vector.broadcast %cst_32 : f32 to vector<16x16xf32>
    %335 = arith.mulf %334, %333 : vector<16x16xf32>
    %336 = arith.maximumf %333, %335 : vector<16x16xf32>
    %337 = vector.extract_strided_slice %7 {offsets = [1, 19], sizes = [1, 1], strides = [1, 1]} : vector<3x32xf32> to vector<1x1xf32>
    %338 = vector.broadcast %337 : vector<1x1xf32> to vector<16x16xf32>
    %339 = arith.mulf %338, %336 : vector<16x16xf32>
    %340 = arith.addf %324, %339 : vector<16x16xf32>
    %341 = vector.extract_strided_slice %4 {offsets = [0, 20], sizes = [16, 1], strides = [1, 1]} : vector<16x32xf32> to vector<16x1xf32>
    %342 = vector.extract_strided_slice %5 {offsets = [20, 0], sizes = [1, 16], strides = [1, 1]} : vector<32x16xf32> to vector<1x16xf32>
    %343 = vector.broadcast %341 : vector<16x1xf32> to vector<16x16xf32>
    %344 = vector.broadcast %342 : vector<1x16xf32> to vector<16x16xf32>
    %345 = arith.addf %343, %344 : vector<16x16xf32>
    %346 = vector.extract_strided_slice %7 {offsets = [0, 20], sizes = [1, 1], strides = [1, 1]} : vector<3x32xf32> to vector<1x1xf32>
    %347 = vector.broadcast %346 : vector<1x1xf32> to vector<16x16xf32>
    %348 = arith.mulf %347, %1 : vector<16x16xf32>
    %349 = arith.addf %345, %348 : vector<16x16xf32>
    %cst_33 = arith.constant 2.000000e-01 : f32
    %350 = vector.broadcast %cst_33 : f32 to vector<16x16xf32>
    %351 = arith.mulf %350, %349 : vector<16x16xf32>
    %352 = arith.maximumf %349, %351 : vector<16x16xf32>
    %353 = vector.extract_strided_slice %7 {offsets = [1, 20], sizes = [1, 1], strides = [1, 1]} : vector<3x32xf32> to vector<1x1xf32>
    %354 = vector.broadcast %353 : vector<1x1xf32> to vector<16x16xf32>
    %355 = arith.mulf %354, %352 : vector<16x16xf32>
    %356 = arith.addf %340, %355 : vector<16x16xf32>
    %357 = vector.extract_strided_slice %4 {offsets = [0, 21], sizes = [16, 1], strides = [1, 1]} : vector<16x32xf32> to vector<16x1xf32>
    %358 = vector.extract_strided_slice %5 {offsets = [21, 0], sizes = [1, 16], strides = [1, 1]} : vector<32x16xf32> to vector<1x16xf32>
    %359 = vector.broadcast %357 : vector<16x1xf32> to vector<16x16xf32>
    %360 = vector.broadcast %358 : vector<1x16xf32> to vector<16x16xf32>
    %361 = arith.addf %359, %360 : vector<16x16xf32>
    %362 = vector.extract_strided_slice %7 {offsets = [0, 21], sizes = [1, 1], strides = [1, 1]} : vector<3x32xf32> to vector<1x1xf32>
    %363 = vector.broadcast %362 : vector<1x1xf32> to vector<16x16xf32>
    %364 = arith.mulf %363, %1 : vector<16x16xf32>
    %365 = arith.addf %361, %364 : vector<16x16xf32>
    %cst_34 = arith.constant 2.000000e-01 : f32
    %366 = vector.broadcast %cst_34 : f32 to vector<16x16xf32>
    %367 = arith.mulf %366, %365 : vector<16x16xf32>
    %368 = arith.maximumf %365, %367 : vector<16x16xf32>
    %369 = vector.extract_strided_slice %7 {offsets = [1, 21], sizes = [1, 1], strides = [1, 1]} : vector<3x32xf32> to vector<1x1xf32>
    %370 = vector.broadcast %369 : vector<1x1xf32> to vector<16x16xf32>
    %371 = arith.mulf %370, %368 : vector<16x16xf32>
    %372 = arith.addf %356, %371 : vector<16x16xf32>
    %373 = vector.extract_strided_slice %4 {offsets = [0, 22], sizes = [16, 1], strides = [1, 1]} : vector<16x32xf32> to vector<16x1xf32>
    %374 = vector.extract_strided_slice %5 {offsets = [22, 0], sizes = [1, 16], strides = [1, 1]} : vector<32x16xf32> to vector<1x16xf32>
    %375 = vector.broadcast %373 : vector<16x1xf32> to vector<16x16xf32>
    %376 = vector.broadcast %374 : vector<1x16xf32> to vector<16x16xf32>
    %377 = arith.addf %375, %376 : vector<16x16xf32>
    %378 = vector.extract_strided_slice %7 {offsets = [0, 22], sizes = [1, 1], strides = [1, 1]} : vector<3x32xf32> to vector<1x1xf32>
    %379 = vector.broadcast %378 : vector<1x1xf32> to vector<16x16xf32>
    %380 = arith.mulf %379, %1 : vector<16x16xf32>
    %381 = arith.addf %377, %380 : vector<16x16xf32>
    %cst_35 = arith.constant 2.000000e-01 : f32
    %382 = vector.broadcast %cst_35 : f32 to vector<16x16xf32>
    %383 = arith.mulf %382, %381 : vector<16x16xf32>
    %384 = arith.maximumf %381, %383 : vector<16x16xf32>
    %385 = vector.extract_strided_slice %7 {offsets = [1, 22], sizes = [1, 1], strides = [1, 1]} : vector<3x32xf32> to vector<1x1xf32>
    %386 = vector.broadcast %385 : vector<1x1xf32> to vector<16x16xf32>
    %387 = arith.mulf %386, %384 : vector<16x16xf32>
    %388 = arith.addf %372, %387 : vector<16x16xf32>
    %389 = vector.extract_strided_slice %4 {offsets = [0, 23], sizes = [16, 1], strides = [1, 1]} : vector<16x32xf32> to vector<16x1xf32>
    %390 = vector.extract_strided_slice %5 {offsets = [23, 0], sizes = [1, 16], strides = [1, 1]} : vector<32x16xf32> to vector<1x16xf32>
    %391 = vector.broadcast %389 : vector<16x1xf32> to vector<16x16xf32>
    %392 = vector.broadcast %390 : vector<1x16xf32> to vector<16x16xf32>
    %393 = arith.addf %391, %392 : vector<16x16xf32>
    %394 = vector.extract_strided_slice %7 {offsets = [0, 23], sizes = [1, 1], strides = [1, 1]} : vector<3x32xf32> to vector<1x1xf32>
    %395 = vector.broadcast %394 : vector<1x1xf32> to vector<16x16xf32>
    %396 = arith.mulf %395, %1 : vector<16x16xf32>
    %397 = arith.addf %393, %396 : vector<16x16xf32>
    %cst_36 = arith.constant 2.000000e-01 : f32
    %398 = vector.broadcast %cst_36 : f32 to vector<16x16xf32>
    %399 = arith.mulf %398, %397 : vector<16x16xf32>
    %400 = arith.maximumf %397, %399 : vector<16x16xf32>
    %401 = vector.extract_strided_slice %7 {offsets = [1, 23], sizes = [1, 1], strides = [1, 1]} : vector<3x32xf32> to vector<1x1xf32>
    %402 = vector.broadcast %401 : vector<1x1xf32> to vector<16x16xf32>
    %403 = arith.mulf %402, %400 : vector<16x16xf32>
    %404 = arith.addf %388, %403 : vector<16x16xf32>
    %405 = vector.extract_strided_slice %4 {offsets = [0, 24], sizes = [16, 1], strides = [1, 1]} : vector<16x32xf32> to vector<16x1xf32>
    %406 = vector.extract_strided_slice %5 {offsets = [24, 0], sizes = [1, 16], strides = [1, 1]} : vector<32x16xf32> to vector<1x16xf32>
    %407 = vector.broadcast %405 : vector<16x1xf32> to vector<16x16xf32>
    %408 = vector.broadcast %406 : vector<1x16xf32> to vector<16x16xf32>
    %409 = arith.addf %407, %408 : vector<16x16xf32>
    %410 = vector.extract_strided_slice %7 {offsets = [0, 24], sizes = [1, 1], strides = [1, 1]} : vector<3x32xf32> to vector<1x1xf32>
    %411 = vector.broadcast %410 : vector<1x1xf32> to vector<16x16xf32>
    %412 = arith.mulf %411, %1 : vector<16x16xf32>
    %413 = arith.addf %409, %412 : vector<16x16xf32>
    %cst_37 = arith.constant 2.000000e-01 : f32
    %414 = vector.broadcast %cst_37 : f32 to vector<16x16xf32>
    %415 = arith.mulf %414, %413 : vector<16x16xf32>
    %416 = arith.maximumf %413, %415 : vector<16x16xf32>
    %417 = vector.extract_strided_slice %7 {offsets = [1, 24], sizes = [1, 1], strides = [1, 1]} : vector<3x32xf32> to vector<1x1xf32>
    %418 = vector.broadcast %417 : vector<1x1xf32> to vector<16x16xf32>
    %419 = arith.mulf %418, %416 : vector<16x16xf32>
    %420 = arith.addf %404, %419 : vector<16x16xf32>
    %421 = vector.extract_strided_slice %4 {offsets = [0, 25], sizes = [16, 1], strides = [1, 1]} : vector<16x32xf32> to vector<16x1xf32>
    %422 = vector.extract_strided_slice %5 {offsets = [25, 0], sizes = [1, 16], strides = [1, 1]} : vector<32x16xf32> to vector<1x16xf32>
    %423 = vector.broadcast %421 : vector<16x1xf32> to vector<16x16xf32>
    %424 = vector.broadcast %422 : vector<1x16xf32> to vector<16x16xf32>
    %425 = arith.addf %423, %424 : vector<16x16xf32>
    %426 = vector.extract_strided_slice %7 {offsets = [0, 25], sizes = [1, 1], strides = [1, 1]} : vector<3x32xf32> to vector<1x1xf32>
    %427 = vector.broadcast %426 : vector<1x1xf32> to vector<16x16xf32>
    %428 = arith.mulf %427, %1 : vector<16x16xf32>
    %429 = arith.addf %425, %428 : vector<16x16xf32>
    %cst_38 = arith.constant 2.000000e-01 : f32
    %430 = vector.broadcast %cst_38 : f32 to vector<16x16xf32>
    %431 = arith.mulf %430, %429 : vector<16x16xf32>
    %432 = arith.maximumf %429, %431 : vector<16x16xf32>
    %433 = vector.extract_strided_slice %7 {offsets = [1, 25], sizes = [1, 1], strides = [1, 1]} : vector<3x32xf32> to vector<1x1xf32>
    %434 = vector.broadcast %433 : vector<1x1xf32> to vector<16x16xf32>
    %435 = arith.mulf %434, %432 : vector<16x16xf32>
    %436 = arith.addf %420, %435 : vector<16x16xf32>
    %437 = vector.extract_strided_slice %4 {offsets = [0, 26], sizes = [16, 1], strides = [1, 1]} : vector<16x32xf32> to vector<16x1xf32>
    %438 = vector.extract_strided_slice %5 {offsets = [26, 0], sizes = [1, 16], strides = [1, 1]} : vector<32x16xf32> to vector<1x16xf32>
    %439 = vector.broadcast %437 : vector<16x1xf32> to vector<16x16xf32>
    %440 = vector.broadcast %438 : vector<1x16xf32> to vector<16x16xf32>
    %441 = arith.addf %439, %440 : vector<16x16xf32>
    %442 = vector.extract_strided_slice %7 {offsets = [0, 26], sizes = [1, 1], strides = [1, 1]} : vector<3x32xf32> to vector<1x1xf32>
    %443 = vector.broadcast %442 : vector<1x1xf32> to vector<16x16xf32>
    %444 = arith.mulf %443, %1 : vector<16x16xf32>
    %445 = arith.addf %441, %444 : vector<16x16xf32>
    %cst_39 = arith.constant 2.000000e-01 : f32
    %446 = vector.broadcast %cst_39 : f32 to vector<16x16xf32>
    %447 = arith.mulf %446, %445 : vector<16x16xf32>
    %448 = arith.maximumf %445, %447 : vector<16x16xf32>
    %449 = vector.extract_strided_slice %7 {offsets = [1, 26], sizes = [1, 1], strides = [1, 1]} : vector<3x32xf32> to vector<1x1xf32>
    %450 = vector.broadcast %449 : vector<1x1xf32> to vector<16x16xf32>
    %451 = arith.mulf %450, %448 : vector<16x16xf32>
    %452 = arith.addf %436, %451 : vector<16x16xf32>
    %453 = vector.extract_strided_slice %4 {offsets = [0, 27], sizes = [16, 1], strides = [1, 1]} : vector<16x32xf32> to vector<16x1xf32>
    %454 = vector.extract_strided_slice %5 {offsets = [27, 0], sizes = [1, 16], strides = [1, 1]} : vector<32x16xf32> to vector<1x16xf32>
    %455 = vector.broadcast %453 : vector<16x1xf32> to vector<16x16xf32>
    %456 = vector.broadcast %454 : vector<1x16xf32> to vector<16x16xf32>
    %457 = arith.addf %455, %456 : vector<16x16xf32>
    %458 = vector.extract_strided_slice %7 {offsets = [0, 27], sizes = [1, 1], strides = [1, 1]} : vector<3x32xf32> to vector<1x1xf32>
    %459 = vector.broadcast %458 : vector<1x1xf32> to vector<16x16xf32>
    %460 = arith.mulf %459, %1 : vector<16x16xf32>
    %461 = arith.addf %457, %460 : vector<16x16xf32>
    %cst_40 = arith.constant 2.000000e-01 : f32
    %462 = vector.broadcast %cst_40 : f32 to vector<16x16xf32>
    %463 = arith.mulf %462, %461 : vector<16x16xf32>
    %464 = arith.maximumf %461, %463 : vector<16x16xf32>
    %465 = vector.extract_strided_slice %7 {offsets = [1, 27], sizes = [1, 1], strides = [1, 1]} : vector<3x32xf32> to vector<1x1xf32>
    %466 = vector.broadcast %465 : vector<1x1xf32> to vector<16x16xf32>
    %467 = arith.mulf %466, %464 : vector<16x16xf32>
    %468 = arith.addf %452, %467 : vector<16x16xf32>
    %469 = vector.extract_strided_slice %4 {offsets = [0, 28], sizes = [16, 1], strides = [1, 1]} : vector<16x32xf32> to vector<16x1xf32>
    %470 = vector.extract_strided_slice %5 {offsets = [28, 0], sizes = [1, 16], strides = [1, 1]} : vector<32x16xf32> to vector<1x16xf32>
    %471 = vector.broadcast %469 : vector<16x1xf32> to vector<16x16xf32>
    %472 = vector.broadcast %470 : vector<1x16xf32> to vector<16x16xf32>
    %473 = arith.addf %471, %472 : vector<16x16xf32>
    %474 = vector.extract_strided_slice %7 {offsets = [0, 28], sizes = [1, 1], strides = [1, 1]} : vector<3x32xf32> to vector<1x1xf32>
    %475 = vector.broadcast %474 : vector<1x1xf32> to vector<16x16xf32>
    %476 = arith.mulf %475, %1 : vector<16x16xf32>
    %477 = arith.addf %473, %476 : vector<16x16xf32>
    %cst_41 = arith.constant 2.000000e-01 : f32
    %478 = vector.broadcast %cst_41 : f32 to vector<16x16xf32>
    %479 = arith.mulf %478, %477 : vector<16x16xf32>
    %480 = arith.maximumf %477, %479 : vector<16x16xf32>
    %481 = vector.extract_strided_slice %7 {offsets = [1, 28], sizes = [1, 1], strides = [1, 1]} : vector<3x32xf32> to vector<1x1xf32>
    %482 = vector.broadcast %481 : vector<1x1xf32> to vector<16x16xf32>
    %483 = arith.mulf %482, %480 : vector<16x16xf32>
    %484 = arith.addf %468, %483 : vector<16x16xf32>
    %485 = vector.extract_strided_slice %4 {offsets = [0, 29], sizes = [16, 1], strides = [1, 1]} : vector<16x32xf32> to vector<16x1xf32>
    %486 = vector.extract_strided_slice %5 {offsets = [29, 0], sizes = [1, 16], strides = [1, 1]} : vector<32x16xf32> to vector<1x16xf32>
    %487 = vector.broadcast %485 : vector<16x1xf32> to vector<16x16xf32>
    %488 = vector.broadcast %486 : vector<1x16xf32> to vector<16x16xf32>
    %489 = arith.addf %487, %488 : vector<16x16xf32>
    %490 = vector.extract_strided_slice %7 {offsets = [0, 29], sizes = [1, 1], strides = [1, 1]} : vector<3x32xf32> to vector<1x1xf32>
    %491 = vector.broadcast %490 : vector<1x1xf32> to vector<16x16xf32>
    %492 = arith.mulf %491, %1 : vector<16x16xf32>
    %493 = arith.addf %489, %492 : vector<16x16xf32>
    %cst_42 = arith.constant 2.000000e-01 : f32
    %494 = vector.broadcast %cst_42 : f32 to vector<16x16xf32>
    %495 = arith.mulf %494, %493 : vector<16x16xf32>
    %496 = arith.maximumf %493, %495 : vector<16x16xf32>
    %497 = vector.extract_strided_slice %7 {offsets = [1, 29], sizes = [1, 1], strides = [1, 1]} : vector<3x32xf32> to vector<1x1xf32>
    %498 = vector.broadcast %497 : vector<1x1xf32> to vector<16x16xf32>
    %499 = arith.mulf %498, %496 : vector<16x16xf32>
    %500 = arith.addf %484, %499 : vector<16x16xf32>
    %501 = vector.extract_strided_slice %4 {offsets = [0, 30], sizes = [16, 1], strides = [1, 1]} : vector<16x32xf32> to vector<16x1xf32>
    %502 = vector.extract_strided_slice %5 {offsets = [30, 0], sizes = [1, 16], strides = [1, 1]} : vector<32x16xf32> to vector<1x16xf32>
    %503 = vector.broadcast %501 : vector<16x1xf32> to vector<16x16xf32>
    %504 = vector.broadcast %502 : vector<1x16xf32> to vector<16x16xf32>
    %505 = arith.addf %503, %504 : vector<16x16xf32>
    %506 = vector.extract_strided_slice %7 {offsets = [0, 30], sizes = [1, 1], strides = [1, 1]} : vector<3x32xf32> to vector<1x1xf32>
    %507 = vector.broadcast %506 : vector<1x1xf32> to vector<16x16xf32>
    %508 = arith.mulf %507, %1 : vector<16x16xf32>
    %509 = arith.addf %505, %508 : vector<16x16xf32>
    %cst_43 = arith.constant 2.000000e-01 : f32
    %510 = vector.broadcast %cst_43 : f32 to vector<16x16xf32>
    %511 = arith.mulf %510, %509 : vector<16x16xf32>
    %512 = arith.maximumf %509, %511 : vector<16x16xf32>
    %513 = vector.extract_strided_slice %7 {offsets = [1, 30], sizes = [1, 1], strides = [1, 1]} : vector<3x32xf32> to vector<1x1xf32>
    %514 = vector.broadcast %513 : vector<1x1xf32> to vector<16x16xf32>
    %515 = arith.mulf %514, %512 : vector<16x16xf32>
    %516 = arith.addf %500, %515 : vector<16x16xf32>
    %517 = vector.extract_strided_slice %4 {offsets = [0, 31], sizes = [16, 1], strides = [1, 1]} : vector<16x32xf32> to vector<16x1xf32>
    %518 = vector.extract_strided_slice %5 {offsets = [31, 0], sizes = [1, 16], strides = [1, 1]} : vector<32x16xf32> to vector<1x16xf32>
    %519 = vector.broadcast %517 : vector<16x1xf32> to vector<16x16xf32>
    %520 = vector.broadcast %518 : vector<1x16xf32> to vector<16x16xf32>
    %521 = arith.addf %519, %520 : vector<16x16xf32>
    %522 = vector.extract_strided_slice %7 {offsets = [0, 31], sizes = [1, 1], strides = [1, 1]} : vector<3x32xf32> to vector<1x1xf32>
    %523 = vector.broadcast %522 : vector<1x1xf32> to vector<16x16xf32>
    %524 = arith.mulf %523, %1 : vector<16x16xf32>
    %525 = arith.addf %521, %524 : vector<16x16xf32>
    %cst_44 = arith.constant 2.000000e-01 : f32
    %526 = vector.broadcast %cst_44 : f32 to vector<16x16xf32>
    %527 = arith.mulf %526, %525 : vector<16x16xf32>
    %528 = arith.maximumf %525, %527 : vector<16x16xf32>
    %529 = vector.extract_strided_slice %7 {offsets = [1, 31], sizes = [1, 1], strides = [1, 1]} : vector<3x32xf32> to vector<1x1xf32>
    %530 = vector.broadcast %529 : vector<1x1xf32> to vector<16x16xf32>
    %531 = arith.mulf %530, %528 : vector<16x16xf32>
    %532 = arith.addf %516, %531 : vector<16x16xf32>
    %cst_45 = arith.constant dense<0xFF800000> : vector<16xf32>
    %533 = vector.multi_reduction <maximumf>, %532, %cst_45 [1] : vector<16x16xf32> to vector<16xf32>
    %534 = vector.shape_cast %533 : vector<16xf32> to vector<16x1xf32>
    %535 = vector.broadcast %534 : vector<16x1xf32> to vector<16x16xf32>
    %536 = arith.subf %532, %535 : vector<16x16xf32>
    %537 = math.exp %536 : vector<16x16xf32>
    %cst_46 = arith.constant dense<0.000000e+00> : vector<16xf32>
    %538 = vector.multi_reduction <add>, %537, %cst_46 [1] : vector<16x16xf32> to vector<16xf32>
    %539 = vector.shape_cast %538 : vector<16xf32> to vector<16x1xf32>
    %540 = tpu.reciprocal %539 {approx = true} : vector<16x1xf32> -> vector<16x1xf32>
    %541 = arith.truncf %537 : vector<16x16xf32> to vector<16x16xbf16>
    %542 = vector.extract_strided_slice %6 {offsets = [0, 16], sizes = [16, 16], strides = [1, 1]} : vector<16x32xbf16> to vector<16x16xbf16>
    %cst_47 = arith.constant dense<0.000000e+00> : vector<16x16xf32>
    %543 = tpu.matmul %541, %542, %cst_47 {dimension_numbers = #tpu.dot_dimension_numbers<[1], [0], [0], [1], [0, 0, 1, 1], [], []>} : vector<16x16xbf16>, vector<16x16xbf16>, vector<16x16xf32> -> vector<16x16xf32>
    %544 = vector.broadcast %540 : vector<16x1xf32> to vector<16x16xf32>
    %545 = arith.mulf %543, %544 : vector<16x16xf32>
    %546 = tpu.concatenate %276, %545 in 1 : vector<16x16xf32>, vector<16x16xf32> -> vector<16x32xf32>
    %547 = vector.extract_strided_slice %7 {offsets = [2, 0], sizes = [1, 32], strides = [1, 1]} : vector<3x32xf32> to vector<1x32xf32>
    %548 = vector.broadcast %547 : vector<1x32xf32> to vector<16x32xf32>
    %549 = arith.addf %546, %548 : vector<16x32xf32>
    %cst_48 = arith.constant 0.000000e+00 : f32
    %550 = vector.broadcast %cst_48 : f32 to vector<16x32xf32>
    %551 = arith.maximumf %549, %550 : vector<16x32xf32>
    %552 = arith.truncf %551 : vector<16x32xf32> to vector<16x32xbf16>
    %c0_49 = arith.constant 0 : index
    %c0_50 = arith.constant 0 : index
    %553 = vector.load %arg7[%c0_49, %c0_50] : memref<16x32xbf16, #tpu.memory_space<vmem>>, vector<16x32xbf16>
    tpu.vector_store %arg7[%c0_49, %c0_50], %552 {strides = array<i32>} : memref<16x32xbf16, #tpu.memory_space<vmem>>, vector<16x32xbf16>,
    return
  }
  func.func @transform_0(%arg0: i32) -> (i32, i32) {
    %c0_i32 = arith.constant 0 : i32
    %c0_i32_0 = arith.constant 0 : i32
    %c0_i32_1 = arith.constant 0 : i32
    return %c0_i32, %c0_i32_0 : i32, i32
  }
  func.func @transform_1(%arg0: i32) -> (i32, i32) {
    %c0_i32 = arith.constant 0 : i32
    %c0_i32_0 = arith.constant 0 : i32
    %c0_i32_1 = arith.constant 0 : i32
    return %c0_i32, %c0_i32_0 : i32, i32
  }
  func.func @transform_2(%arg0: i32) -> (i32, i32) {
    %c0_i32 = arith.constant 0 : i32
    %c0_i32_0 = arith.constant 0 : i32
    return %arg0, %c0_i32 : i32, i32
  }
  func.func @transform_3(%arg0: i32) -> (i32, i32) {
    %c0_i32 = arith.constant 0 : i32
    %c0_i32_0 = arith.constant 0 : i32
    return %arg0, %c0_i32 : i32, i32
  }
  func.func @transform_4(%arg0: i32) -> (i32, i32) {
    %c0_i32 = arith.constant 0 : i32
    %c0_i32_0 = arith.constant 0 : i32
    return %arg0, %c0_i32 : i32, i32
  }
  func.func @transform_5(%arg0: i32) -> (i32, i32) {
    %c0_i32 = arith.constant 0 : i32
    %c0_i32_0 = arith.constant 0 : i32
    %c0_i32_1 = arith.constant 0 : i32
    return %c0_i32, %c0_i32_0 : i32, i32
  }
  func.func @transform_6(%arg0: i32) -> (i32, i32) {
    %c0_i32 = arith.constant 0 : i32
    %c0_i32_0 = arith.constant 0 : i32
    return %arg0, %c0_i32 : i32, i32
  }
}

</mosaic_0001>

<bundles_post_ra>
// kernel: tpu_custom_call.1
= control target key start
LH: loop header
LB: loop body
LE: loop exit
PB: predicated region body
PF: predicated region fallthrough
CT: control target
= control target key end

     0   :  { %s2895_s0 = inlined_call_operand.vmem [shape: bf16[16,32], index: 0, kind: input, shape index: {}]   ;;  %s2896_s1 = inlined_call_operand.vmem [shape: f32[32,16], index: 1, kind: input, shape index: {}]   ;;  %s2897_s2 = inlined_call_operand.vmem [shape: f32[16,32], index: 2, kind: input, shape index: {}]   ;;  %s2898_s3 = inlined_call_operand.vmem [shape: bf16[16,16], index: 3, kind: input, shape index: {}]   ;;  %s2899_s4 = inlined_call_operand.vmem [shape: bf16[16,16], index: 4, kind: input, shape index: {}]   ;;  %s2900_s5 = inlined_call_operand.vmem [shape: f32[3,32], index: 5, kind: input, shape index: {}]   ;;  %s2901_s6 = inlined_call_operand.hbm [shape: bf16[16,32], index: 6, kind: output, shape index: {}]  }
   0x1   :  { %2944 = sst [smem:[#allocation42_spill]] %s2895_s0 }
   0x2   :  { %2945 = sst [smem:[#allocation43_spill]] %s2896_s1 }
   0x3   :  { %2946 = sst [smem:[#allocation44_spill]] %s2900_s5 }
   0x4   :  { %2947 = sst [smem:[#allocation45_spill]] %s2901_s6 }
   0x5   :  { %v1817_v0 = vld [vmem:[%s2900_s5] sm:$0x7]  ;;  %s1710_s23 = smov 126   ;;  %s1711_s24 = smov 127   ;;  %v1712_v2 = vmov 16  }
   0x6   :  { %128 = vrot.lane.b32.xlu1 %v1817_v0, %s1710_s23  ;;  %92 = vrot.lane.b32.xlu0 %v1817_v0, %s1711_s24  ;;  %v1822_v1 = vrot.slane %v1817_v0, 1  ;;  %1414 = vpush %v1817_v0 }
   0x7   :  { %1612 = vset.pattern.permute.xlu1 %v1712_v2  ;;  %1611 = vset.pattern.permute.xlu0 %v1712_v2 }
   0x8   :  { %1416 = vpush %v1822_v1 }
   0x9   :  { %11 = vsyncpa [#allocation3], 0  ;;  %s1713_s25 = smov 125   ;;  %s1714_s26 = smov 124   ;;  %v1891_v7 = vld [vmem:[%s2897_s2 + $0x8] sm:$0xff]  ;;  %v1896_v8 = vld [vmem:[%s2897_s2] sm:$0xff] }
   0xa   :  { %141 = vrot.lane.b32.xlu1 %v1822_v1, %s1710_s23  ;;  %105 = vrot.lane.b32.xlu0 %v1822_v1, %s1711_s24  ;;  %s1715_s27 = smov 123   ;;  %s1716_s28 = smov 122   ;;  %v1742_v13 = vmov 17   ;;  %v1743_v16 = vmov 18   ;;  %v1744_v17 = vmov 19   ;;  %v1745_v22 = vmov 20  }
   0xb   :  { %s1717_s29 = smov 121   ;;  %s1718_s30 = smov 120   ;;  %v1746_v25 = vmov 22   ;;  %v1747_v28 = vmov 23   ;;  %v1748_v31 = vmov 21   ;;  %v1749_v32 = vmov 25  }
   0xc   :  { %s1719_s7 = smov 119   ;;  %s1720_s8 = smov 118   ;;  %v1750_v37 = vmov 26   ;;  %v1751_v40 = vmov 28   ;;  %v1752_v43 = vmov 29   ;;  %v1753_v46 = vmov 24  }
   0xd   :  { %s1721_s9 = smov 117   ;;  %s1722_s10 = smov 116   ;;  %v1754_v47 = vmov 31   ;;  %v1755_v52 = vmov 0   ;;  %v1756_v55 = vmov 2   ;;  %v1757_v58 = vmov 3  }
   0xe   :  { %177 = vrot.lane.b32.xlu1 %v1822_v1, %s1713_s25  ;;  %164 = vrot.lane.b32.xlu0 %v1817_v0, %s1713_s25  ;;  %s1723_s11 = smov 115   ;;  %s1724_s12 = smov 114   ;;  %v1758_v61 = vmov 27   ;;  %v1759_v62 = vmov 5   ;;  %vm618_vm0 = vcmask 130048   ;;  %vm1774_vm1 = vmmov 0  }
   0xf   :  { %s1725_s13 = smov 113   ;;  %s2902_s14 = smov 112   ;;  %vm1364_vm2 = vcmask 257024  }
  0x10   :  { %s1727_s15 = smov 111   ;;  %s1728_s16 = smov 110  }
  0x11   :  { %s1729_s17 = smov 109   ;;  %s1730_s18 = smov 108  }
  0x12   :  { %213 = vrot.lane.b32.xlu1 %v1822_v1, %s1714_s26  ;;  %200 = vrot.lane.b32.xlu0 %v1817_v0, %s1714_s26  ;;  %s1731_s19 = smov 107   ;;  %s1732_s20 = smov 106  }
  0x13   :  { %s1733_s21 = smov 105   ;;  %s1734_s22 = smov 104  }
  0x14   :  { %s1735_s23 = smov 103   ;;  %s1736_s24 = smov 102  }
  0x15   :  { %s1737_s25 = smov 101   ;;  %s1738_s26 = smov 100  }
  0x16   :  { %249 = vrot.lane.b32.xlu1 %v1822_v1, %s1715_s27  ;;  %236 = vrot.lane.b32.xlu0 %v1817_v0, %s1715_s27  ;;  %s1739_s27 = smov 99  }
  0x1a   :  { %285 = vrot.lane.b32.xlu1 %v1822_v1, %s1716_s28  ;;  %272 = vrot.lane.b32.xlu0 %v1817_v0, %s1716_s28  ;;  %s1740_s28 = smov 98  }
  0x1e   :  { %321 = vrot.lane.b32.xlu1 %v1822_v1, %s1717_s29  ;;  %308 = vrot.lane.b32.xlu0 %v1817_v0, %s1717_s29  ;;  %s1741_s29 = smov 97  }
  0x22   :  { %357 = vrot.lane.b32.xlu1 %v1822_v1, %s1718_s30  ;;  %344 = vrot.lane.b32.xlu0 %v1817_v0, %s1718_s30 }
  0x26   :  { %393 = vrot.lane.b32.xlu1 %v1822_v1, %s1719_s7  ;;  %380 = vrot.lane.b32.xlu0 %v1817_v0, %s1719_s7 }
  0x2a   :  { %429 = vrot.lane.b32.xlu1 %v1822_v1, %s1720_s8  ;;  %416 = vrot.lane.b32.xlu0 %v1817_v0, %s1720_s8 }
  0x2e   :  { %465 = vrot.lane.b32.xlu1 %v1822_v1, %s1721_s9  ;;  %452 = vrot.lane.b32.xlu0 %v1817_v0, %s1721_s9 }
  0x32   :  { %501 = vrot.lane.b32.xlu1 %v1822_v1, %s1722_s10  ;;  %488 = vrot.lane.b32.xlu0 %v1817_v0, %s1722_s10 }
  0x36   :  { %537 = vrot.lane.b32.xlu1 %v1822_v1, %s1723_s11  ;;  %524 = vrot.lane.b32.xlu0 %v1817_v0, %s1723_s11 }
  0x37   :  { %s1947_s10 = spop %1414 }
  0x39   :  { %s1952_s11 = spop %1416 }
  0x3a   :  { %573 = vrot.lane.b32.xlu1 %v1822_v1, %s1724_s12  ;;  %560 = vrot.lane.b32.xlu0 %v1817_v0, %s1724_s12 }
  0x3e   :  { %609 = vrot.lane.b32.xlu1 %v1822_v1, %s1725_s13  ;;  %596 = vrot.lane.b32.xlu0 %v1817_v0, %s1725_s13 }
  0x42   :  { %719 = vrot.lane.b32.xlu1 %v1822_v1, %s2902_s14  ;;  %706 = vrot.lane.b32.xlu0 %v1817_v0, %s2902_s14 }
  0x46   :  { %755 = vrot.lane.b32.xlu1 %v1822_v1, %s1727_s15  ;;  %742 = vrot.lane.b32.xlu0 %v1817_v0, %s1727_s15 }
  0x4a   :  { %791 = vrot.lane.b32.xlu1 %v1822_v1, %s1728_s16  ;;  %778 = vrot.lane.b32.xlu0 %v1817_v0, %s1728_s16 }
  0x4e   :  { %827 = vrot.lane.b32.xlu1 %v1822_v1, %s1729_s17  ;;  %814 = vrot.lane.b32.xlu0 %v1817_v0, %s1729_s17 }
  0x52   :  { %863 = vrot.lane.b32.xlu1 %v1822_v1, %s1730_s18  ;;  %850 = vrot.lane.b32.xlu0 %v1817_v0, %s1730_s18 }
  0x56   :  { %899 = vrot.lane.b32.xlu1 %v1822_v1, %s1731_s19  ;;  %886 = vrot.lane.b32.xlu0 %v1817_v0, %s1731_s19 }
  0x5a   :  { %935 = vrot.lane.b32.xlu1 %v1822_v1, %s1732_s20  ;;  %922 = vrot.lane.b32.xlu0 %v1817_v0, %s1732_s20 }
  0x5e   :  { %971 = vrot.lane.b32.xlu1 %v1822_v1, %s1733_s21  ;;  %958 = vrot.lane.b32.xlu0 %v1817_v0, %s1733_s21 }
  0x62   :  { %1007 = vrot.lane.b32.xlu1 %v1822_v1, %s1734_s22  ;;  %994 = vrot.lane.b32.xlu0 %v1817_v0, %s1734_s22 }
  0x66   :  { %1043 = vrot.lane.b32.xlu1 %v1822_v1, %s1735_s23  ;;  %1030 = vrot.lane.b32.xlu0 %v1817_v0, %s1735_s23 }
  0x6a   :  { %1079 = vrot.lane.b32.xlu1 %v1822_v1, %s1736_s24  ;;  %1066 = vrot.lane.b32.xlu0 %v1817_v0, %s1736_s24 }
  0x6e   :  { %1115 = vrot.lane.b32.xlu1 %v1822_v1, %s1737_s25  ;;  %1102 = vrot.lane.b32.xlu0 %v1817_v0, %s1737_s25 }
  0x72   :  { %1151 = vrot.lane.b32.xlu1 %v1822_v1, %s1738_s26  ;;  %1138 = vrot.lane.b32.xlu0 %v1817_v0, %s1738_s26 }
  0x76   :  { %1187 = vrot.lane.b32.xlu1 %v1822_v1, %s1739_s27  ;;  %1174 = vrot.lane.b32.xlu0 %v1817_v0, %s1739_s27 }
  0x78   :  { %v129_v3 = vpop.permute.xlu1 %128  ;;  %v93_v4 = vpop.permute.xlu0 %92 }
  0x79   :  { %1418 = vpush %v93_v4 }
  0x7a   :  { %1223 = vrot.lane.b32.xlu1 %v1822_v1, %s1740_s28  ;;  %1210 = vrot.lane.b32.xlu0 %v1817_v0, %s1740_s28 }
  0x7c   :  { %v142_v5 = vpop.permute.xlu1 %141  ;;  %v106_v6 = vpop.permute.xlu0 %105 }
  0x7d   :  { %1420 = vpush %v106_v6  ;;  %v2916_v6 = vmov 8  }
  0x7e   :  { %1422 = vpush %v129_v3  ;;  %1259 = vrot.lane.b32.xlu1 %v1822_v1, %s1741_s29  ;;  %1246 = vrot.lane.b32.xlu0 %v1817_v0, %s1741_s29  ;;  %v1760_v3 = vmov 6  }
  0x7f   :  { %1424 = vpush %v142_v5 }
  0x80   :  { %v178_v9 = vpop.permute.xlu1 %177  ;;  %v165_v10 = vpop.permute.xlu0 %164 }
  0x81   :  { %1426 = vpush %v165_v10 }
  0x82   :  { %1428 = vpush %v178_v9  ;;  %697 = vperm.xlu1 %1612, %v1891_v7   ;;  %693 = vperm.xlu0 %1611, %v1896_v8  }
  0x84   :  { %v214_v11 = vpop.permute.xlu1 %213  ;;  %v201_v12 = vpop.permute.xlu0 %200 }
  0x85   :  { %1430 = vpush %v201_v12  ;;  %v1763_v12 = vmov 30  }
  0x86   :  { %1432 = vpush %v214_v11  ;;  %1613 = vset.pattern.permute.xlu1 %v1742_v13  ;;  %1614 = vset.pattern.permute.xlu0 %v1742_v13  ;;  %v2914_v11 = vmov 9  }
  0x87   :  { %729 = vperm.xlu1 %1613, %v1896_v8   ;;  %733 = vperm.xlu0 %1614, %v1891_v7  }
  0x88   :  { %v250_v14 = vpop.permute.xlu1 %249  ;;  %v237_v15 = vpop.permute.xlu0 %236 }
  0x89   :  { %1434 = vpush %v237_v15  ;;  %v2913_v15 = vmov 11  }
  0x8a   :  { %1436 = vpush %v250_v14 }
  0x8b   :  { %1615 = vset.pattern.permute.xlu1 %v1743_v16  ;;  %1616 = vset.pattern.permute.xlu0 %v1744_v17 }
  0x8c   :  { %v286_v18 = vpop.permute.xlu1 %285  ;;  %v273_v19 = vpop.permute.xlu0 %272  ;;  %765 = vperm.xlu1 %1615, %v1896_v8   ;;  %801 = vperm.xlu0 %1616, %v1896_v8  }
  0x8d   :  { %1438 = vpush %v273_v19 }
  0x8e   :  { %1440 = vpush %v286_v18 }
  0x90   :  { %v322_v20 = vpop.permute.xlu1 %321  ;;  %v309_v21 = vpop.permute.xlu0 %308  ;;  %769 = vperm.xlu1 %1615, %v1891_v7   ;;  %1619 = vset.pattern.permute.xlu0 %v1745_v22 }
  0x91   :  { %1442 = vpush %v309_v21  ;;  %841 = vperm.xlu0 %1619, %v1891_v7  }
  0x92   :  { %1444 = vpush %v322_v20  ;;  %v2912_v20 = vmov 12  }
  0x94   :  { %v358_v23 = vpop.permute.xlu1 %357  ;;  %v345_v24 = vpop.permute.xlu0 %344  ;;  %1617 = vset.pattern.permute.xlu1 %v1744_v17 }
  0x95   :  { %1446 = vpush %v345_v24  ;;  %805 = vperm.xlu1 %1617, %v1891_v7   ;;  %1621 = vset.pattern.permute.xlu0 %v1746_v25 }
  0x96   :  { %1448 = vpush %v358_v23  ;;  %909 = vperm.xlu0 %1621, %v1896_v8   ;;  %v2908_v23 = vmov 14  }
  0x98   :  { %v394_v26 = vpop.permute.xlu1 %393  ;;  %v381_v27 = vpop.permute.xlu0 %380 }
  0x99   :  { %1450 = vpush %v381_v27  ;;  %1618 = vset.pattern.permute.xlu1 %v1745_v22  ;;  %v2906_v27 = vmov 15  }
  0x9a   :  { %1452 = vpush %v394_v26  ;;  %837 = vperm.xlu1 %1618, %v1896_v8   ;;  %1624 = vset.pattern.permute.xlu0 %v1747_v28  ;;  %v1767_v26 = vmov 1  }
  0x9b   :  { %949 = vperm.xlu0 %1624, %v1891_v7  }
  0x9c   :  { %v430_v29 = vpop.permute.xlu1 %429  ;;  %v417_v30 = vpop.permute.xlu0 %416 }
  0x9d   :  { %1454 = vpush %v417_v30 }
  0x9e   :  { %1456 = vpush %v430_v29  ;;  %1620 = vset.pattern.permute.xlu1 %v1748_v31 }
  0x9f   :  { %873 = vperm.xlu1 %1620, %v1896_v8   ;;  %1626 = vset.pattern.permute.xlu0 %v1749_v32 }
  0xa0   :  { %v466_v33 = vpop.permute.xlu1 %465  ;;  %v453_v34 = vpop.permute.xlu0 %452  ;;  %1017 = vperm.xlu0 %1626, %v1896_v8  }
  0xa1   :  { %1458 = vpush %v453_v34 }
  0xa2   :  { %1460 = vpush %v466_v33  ;;  %v1769_v33 = vmov 4  }
  0xa3   :  { %877 = vperm.xlu1 %1620, %v1891_v7  }
  0xa4   :  { %v502_v35 = vpop.permute.xlu1 %501  ;;  %v489_v36 = vpop.permute.xlu0 %488  ;;  %1629 = vset.pattern.permute.xlu0 %v1750_v37 }
  0xa5   :  { %1462 = vpush %v489_v36  ;;  %1057 = vperm.xlu0 %1629, %v1891_v7  }
  0xa6   :  { %1464 = vpush %v502_v35  ;;  %v52_v35 = vlaneseq }
  0xa7   :  { %1622 = vset.pattern.permute.xlu1 %v1746_v25 }
  0xa8   :  { %v538_v38 = vpop.permute.xlu1 %537  ;;  %v525_v39 = vpop.permute.xlu0 %524  ;;  %913 = vperm.xlu1 %1622, %v1891_v7   ;;  %v53_v36 = vshrl.u32 %v52_v35, 7 }
  0xa9   :  { %1466 = vpush %v525_v39  ;;  %1631 = vset.pattern.permute.xlu0 %v1751_v40  ;;  %v1391_v39 = vld [vmem:[%s2899_s4] sm:$0xff]  }
  0xaa   :  { %1468 = vpush %v538_v38  ;;  %1125 = vperm.xlu0 %1631, %v1896_v8   ;;  %s1954_s12 = spop %1418 }
  0xac   :  { %v574_v41 = vpop.permute.xlu1 %573  ;;  %v561_v42 = vpop.permute.xlu0 %560  ;;  %1623 = vset.pattern.permute.xlu1 %v1747_v28 }
  0xad   :  { %1470 = vpush %v561_v42  ;;  %945 = vperm.xlu1 %1623, %v1896_v8   ;;  %v2039_v42 = vsub.s32 0, %v53_v36 }
  0xae   :  { %1472 = vpush %v574_v41  ;;  %1634 = vset.pattern.permute.xlu0 %v1752_v43  ;;  %s1958_s13 = spop %1420  ;;  %v60_v41 = vstv %s1947_s10 }
  0xaf   :  { %1165 = vperm.xlu0 %1634, %v1891_v7   ;;  %s1962_s15 = spop %1422 }
  0xb0   :  { %v610_v44 = vpop.permute.xlu1 %609  ;;  %v597_v45 = vpop.permute.xlu0 %596  ;;  %s1964_s16 = spop %1424 }
  0xb1   :  { %1474 = vpush %v597_v45  ;;  %1625 = vset.pattern.permute.xlu1 %v1753_v46  ;;  %v37_v45 = vld [vmem:[%s2896_s1 + $0x10] sm:$0xff]  ;;  %v2054_v46 = vld [vmem:[%s2898_s3] sm:$0xff]  }
  0xb2   :  { %1476 = vpush %v610_v44  ;;  %981 = vperm.xlu1 %1625, %v1896_v8   ;;  %s1968_s17 = spop %1426  ;;  %v2044_v44 = vunpack.c.h.bf16 %v1391_v39 }
  0xb3   :  { %1636 = vset.pattern.permute.xlu0 %v1754_v47  ;;  %s1972_s18 = spop %1428 }
  0xb4   :  { %v720_v48 = vpop.permute.xlu1 %719  ;;  %v707_v49 = vpop.permute.xlu0 %706  ;;  %1233 = vperm.xlu0 %1636, %v1896_v8  }
  0xb5   :  { %1478 = vpush %v707_v49  ;;  %v2061_v49 = vsub.s32 3, %v53_v36 }
  0xb6   :  { %1480 = vpush %v720_v48  ;;  %985 = vperm.xlu1 %1625, %v1891_v7   ;;  %s1974_s19 = spop %1430 }
  0xb7   :  { %s1977_s20 = spop %1432 }
  0xb8   :  { %v756_v50 = vpop.permute.xlu1 %755  ;;  %v743_v51 = vpop.permute.xlu0 %742  ;;  %1639 = vset.pattern.permute.xlu0 %v1755_v52  ;;  %2948 = sst [smem:[#allocation5_spill]] %s1977_s20 }
  0xb9   :  { %1482 = vpush %v743_v51  ;;  %49 = vperm.xlu0 %1639, %v1891_v7   ;;  %v2065_v51 = vsub.s32 4, %v53_v36 }
  0xba   :  { %1484 = vpush %v756_v50  ;;  %1627 = vset.pattern.permute.xlu1 %v1749_v32  ;;  %s1981_s21 = spop %1434 }
  0xbb   :  { %1021 = vperm.xlu1 %1627, %v1891_v7   ;;  %2949 = sst [smem:[#allocation6_spill]] %s1981_s21  ;;  %s1983_s22 = spop %1436  ;;  %2963 = vst [vmem:[#allocation20_spill] sm:$0xff] %v2065_v51 }
  0xbc   :  { %v792_v53 = vpop.permute.xlu1 %791  ;;  %v779_v54 = vpop.permute.xlu0 %778 }
  0xbd   :  { %1486 = vpush %v779_v54  ;;  %1641 = vset.pattern.permute.xlu0 %v1756_v55 }
  0xbe   :  { %1488 = vpush %v792_v53  ;;  %115 = vperm.xlu0 %1641, %v1896_v8   ;;  %s1985_s23 = spop %1438  ;;  %v2069_v53 = vsub.s32 7, %v53_v36 }
  0xbf   :  { %1628 = vset.pattern.permute.xlu1 %v1750_v37  ;;  %2950 = sst [smem:[#allocation7_spill]] %s1985_s23  ;;  %s1989_s24 = spop %1440 }
  0xc0   :  { %v828_v56 = vpop.permute.xlu1 %827  ;;  %v815_v57 = vpop.permute.xlu0 %814  ;;  %1053 = vperm.xlu1 %1628, %v1896_v8   ;;  %2964 = vst [vmem:[#allocation21_spill] sm:$0xff] %v2069_v53 }
  0xc1   :  { %1490 = vpush %v815_v57 }
  0xc2   :  { %1492 = vpush %v828_v56  ;;  %1644 = vset.pattern.permute.xlu0 %v1757_v58  ;;  %s1991_s25 = spop %1442  ;;  %v2079_v56 = vsub.s32 5, %v53_v36 }
  0xc3   :  { %155 = vperm.xlu0 %1644, %v1891_v7   ;;  %2951 = sst [smem:[#allocation8_spill]] %s1991_s25  ;;  %s1994_s26 = spop %1444 }
  0xc4   :  { %v864_v59 = vpop.permute.xlu1 %863  ;;  %v851_v60 = vpop.permute.xlu0 %850  ;;  %1630 = vset.pattern.permute.xlu1 %v1758_v61  ;;  %2952 = sst [smem:[#allocation9_spill]] %s1994_s26  ;;  %2966 = vst [vmem:[#allocation23_spill] sm:$0xff] %v2079_v56  ;;  %v2092_v61 = vld [vmem:[%s2896_s1 + $0x18] sm:$0xff] }
  0xc5   :  { %1494 = vpush %v851_v60  ;;  %1089 = vperm.xlu1 %1630, %v1896_v8  }
  0xc6   :  { %1496 = vpush %v864_v59  ;;  %s1997_s27 = spop %1446 }
  0xc7   :  { %1646 = vset.pattern.permute.xlu0 %v1759_v62  ;;  %2953 = sst [smem:[#allocation10_spill]] %s1997_s27  ;;  %s1999_s28 = spop %1448 }
  0xc8   :  { %v900_v63 = vpop.permute.xlu1 %899  ;;  %v887_v0 = vpop.permute.xlu0 %886  ;;  %223 = vperm.xlu0 %1646, %v1896_v8  }
  0xc9   :  { %1498 = vpush %v887_v0  ;;  %1093 = vperm.xlu1 %1630, %v1891_v7   ;;  %v2099_v0 = vrot.slane %v37_v45, %v2061_v49 }
  0xca   :  { %1500 = vpush %v900_v63  ;;  %s2001_s29 = spop %1450 }
  0xcb   :  { %2954 = sst [smem:[#allocation11_spill]] %s2001_s29  ;;  %s2005_s30 = spop %1452 }
  0xcc   :  { %v936_v1 = vpop.permute.xlu1 %935  ;;  %v923_v2 = vpop.permute.xlu0 %922  ;;  %1649 = vset.pattern.permute.xlu0 %v1760_v3 }
  0xcd   :  { %1502 = vpush %v923_v2  ;;  %1632 = vset.pattern.permute.xlu1 %v1751_v40  ;;  %263 = vperm.xlu0 %1649, %v1891_v7   ;;  %v2034_v40 = vunpack.c.l.bf16 %v1391_v39  ;;  %v2105_v2 = vrot.slane %v37_v45, %v2065_v51 }
  0xce   :  { %1504 = vpush %v936_v1  ;;  %1129 = vperm.xlu1 %1632, %v1891_v7   ;;  %s2007_s7 = spop %1454 }
  0xcf   :  { %2955 = sst [smem:[#allocation12_spill]] %s2007_s7  ;;  %s2009_s8 = spop %1456  ;;  %v2072_v54 = vmul.f32 %v2034_v40, %v60_v41 }
  0xd0   :  { %v972_v4 = vpop.permute.xlu1 %971  ;;  %v959_v5 = vpop.permute.xlu0 %958  ;;  %2956 = sst [smem:[#allocation13_spill]] %s2009_s8 }
  0xd1   :  { %1506 = vpush %v959_v5  ;;  %1651 = vset.pattern.permute.xlu0 %v2916_v6  ;;  %2965 = vst [vmem:[#allocation22_spill] sm:$0xff] %v2072_v54 }
  0xd2   :  { %1508 = vpush %v972_v4  ;;  %1633 = vset.pattern.permute.xlu1 %v1752_v43  ;;  %331 = vperm.xlu0 %1651, %v1896_v8   ;;  %s2015_s9 = spop %1458  ;;  %v2041_v43 = vsub.s32 1, %v53_v36  ;;  %v2905_v4 = vstv %s1962_s15 }
  0xd3   :  { %1161 = vperm.xlu1 %1633, %v1896_v8   ;;  %2957 = sst [smem:[#allocation14_spill]] %s2015_s9  ;;  %s2018_s14 = spop %1460 }
  0xd4   :  { %v1008_v9 = vpop.permute.xlu1 %1007  ;;  %v995_v10 = vpop.permute.xlu0 %994  ;;  %2961 = vst [vmem:[#allocation18_spill] sm:$0xff] %v2041_v43  ;;  %v2087_v60 = vrot.slane %v37_v45, %v2041_v43 }
  0xd5   :  { %1510 = vpush %v995_v10  ;;  %v2904_v10 = vstv %s1968_s17 }
  0xd6   :  { %1512 = vpush %v1008_v9  ;;  %1654 = vset.pattern.permute.xlu0 %v2914_v11  ;;  %s2020_s6 = spop %1462 }
  0xd7   :  { %1635 = vset.pattern.permute.xlu1 %v1763_v12  ;;  %371 = vperm.xlu0 %1654, %v1891_v7   ;;  %2958 = sst [smem:[#allocation15_spill]] %s2020_s6  ;;  %s2030_s7 = spop %1464  ;;  %v2123_v12 = vrot.slane %v37_v45, %v2079_v56 }
  0xd8   :  { %v1044_v13 = vpop.permute.xlu1 %1043  ;;  %v1031_v14 = vpop.permute.xlu0 %1030  ;;  %1197 = vperm.xlu1 %1635, %v1896_v8  }
  0xd9   :  { %1514 = vpush %v1031_v14 }
  0xda   :  { %1516 = vpush %v1044_v13  ;;  %s2032_s26 = spop %1466  ;;  %v2127_v13 = vrot.slane %v2092_v61, %v2041_v43 }
  0xdb   :  { %1656 = vset.pattern.permute.xlu0 %v2913_v15  ;;  %2959 = sst [smem:[#allocation16_spill]] %s2032_s26  ;;  %s2037_s25 = spop %1468 }
  0xdc   :  { %v1080_v16 = vpop.permute.xlu1 %1079  ;;  %v1067_v17 = vpop.permute.xlu0 %1066  ;;  %1201 = vperm.xlu1 %1635, %v1891_v7   ;;  %439 = vperm.xlu0 %1656, %v1896_v8   ;;  %2960 = sst [smem:[#allocation17_spill]] %s2037_s25 }
  0xdd   :  { %1518 = vpush %v1067_v17  ;;  %v2136_v17 = vrot.slane %v2092_v61, %v2065_v51 }
  0xde   :  { %1520 = vpush %v1080_v16  ;;  %s2046_s5 = spop %1470 }
  0xdf   :  { %s2077_s3 = spop %1472 }
  0xe0   :  { %v1116_v18 = vpop.permute.xlu1 %1115  ;;  %v1103_v19 = vpop.permute.xlu0 %1102  ;;  %1637 = vset.pattern.permute.xlu1 %v1754_v47  ;;  %1659 = vset.pattern.permute.xlu0 %v2912_v20  ;;  %v2922_v20 = vstv %s2020_s6 }
  0xe1   :  { %1522 = vpush %v1103_v19  ;;  %1237 = vperm.xlu1 %1637, %v1891_v7   ;;  %479 = vperm.xlu0 %1659, %v1891_v7   ;;  %v2145_v19 = vld [vmem:[%s2896_s1] sm:$0xff] }
  0xe2   :  { %1524 = vpush %v1116_v18  ;;  %s2082_s10 = spop %1474  ;;  %v2140_v18 = vrot.slane %v2092_v61, %v2079_v56  ;;  %2968 = vst [vmem:[#allocation25_spill] sm:$0xff] %v2145_v19  ;;  %v2181_v39 = vrot.slane %v2145_v19, %v2039_v42 }
  0xe3   :  { %s2108_s4 = spop %1476 }
  0xe4   :  { %v1152_v21 = vpop.permute.xlu1 %1151  ;;  %v1139_v22 = vpop.permute.xlu0 %1138  ;;  %2967 = vst [vmem:[#allocation24_spill] sm:$0xff] %v2140_v18 }
  0xe5   :  { %1526 = vpush %v1139_v22  ;;  %1638 = vset.pattern.permute.xlu1 %v1755_v52  ;;  %1661 = vset.pattern.permute.xlu0 %v2908_v23  ;;  %v2067_v52 = vsub.s32 6, %v53_v36  ;;  %v2907_v22 = vstv %s1981_s21 }
  0xe6   :  { %1528 = vpush %v1152_v21  ;;  %44 = vperm.xlu1 %1638, %v1896_v8   ;;  %547 = vperm.xlu0 %1661, %v1896_v8   ;;  %s2120_s8 = spop %1478  ;;  %v2150_v21 = vmul.f32 %v2034_v40, %v2905_v4  ;;  %v2198_v4 = vrot.slane %v2145_v19, %v2061_v49 }
  0xe7   :  { %v2114_v9 = vrot.slane %v37_v45, %v2067_v52  ;;  %s2153_s25 = spop %1480  ;;  %v709_v35 = vstv %s2120_s8 }
  0xe8   :  { %v1188_v24 = vpop.permute.xlu1 %1187  ;;  %v1175_v25 = vpop.permute.xlu0 %1174  ;;  %v711_v15 = vmul.f32 %v2034_v40, %v709_v35 }
  0xe9   :  { %1530 = vpush %v1175_v25  ;;  %v2161_v25 = vrot.slane %v2092_v61, %v2069_v53 }
  0xea   :  { %1532 = vpush %v1188_v24  ;;  %1640 = vset.pattern.permute.xlu1 %v1767_v26  ;;  %1664 = vset.pattern.permute.xlu0 %v2906_v27  ;;  %v2157_v24 = vrot.slane %v2092_v61, %v2039_v42  ;;  %s2171_s20 = spop %1482  ;;  %v2917_v27 = vstv %s2001_s29  ;;  %v712_v26 = vmul.f32 %v2044_v44, %v709_v35 }
  0xeb   :  { %79 = vperm.xlu1 %1640, %v1896_v8   ;;  %587 = vperm.xlu0 %1664, %v1891_v7   ;;  %2969 = vst [vmem:[#allocation26_spill] sm:$0xff] %v2161_v25  ;;  %s2194_s8 = spop %1484  ;;  %v2242_v11 = vmul.f32 %v2044_v44, %v2917_v27  ;;  %v2251_v35 = vrot.slane %v2145_v19, %v2067_v52 }
  0xec   :  { %v1224_v28 = vpop.permute.xlu1 %1223  ;;  %v1211_v29 = vpop.permute.xlu0 %1210 }
  0xed   :  { %1534 = vpush %v1211_v29  ;;  %v2223_v29 = vld [vmem:[%s2896_s1 + $0x8] sm:$0xff]  ;;  %2973 = vst [vmem:[#allocation30_spill] sm:$0xff] %v2242_v11 }
  0xee   :  { %1536 = vpush %v1224_v28  ;;  %v2167_v28 = vmul.f32 %v2044_v44, %v2904_v10  ;;  %v2915_v10 = vstv %s1997_s27  ;;  %s2207_s26 = spop %1486  ;;  %2971 = vst [vmem:[#allocation28_spill] sm:$0xff] %v2223_v29  ;;  %v2261_v59 = vrot.slane %v2223_v29, %v2039_v42  ;;  %v2265_v27 = vrot.slane %v2223_v29, %v2041_v43 }
  0xef   :  { %83 = vperm.xlu1 %1640, %v1891_v7   ;;  %1665 = vset.pattern.permute.xlu0 %v1754_v47  ;;  %v2057_v47 = vsub.s32 2, %v53_v36  ;;  %v2228_v57 = vmul.f32 %v2034_v40, %v2915_v10  ;;  %s2232_s0 = spop %1488  ;;  %v2979_v10 = vmov 8  }
  0xf0   :  { %v1260_v30 = vpop.permute.xlu1 %1259  ;;  %v1247_v31 = vpop.permute.xlu0 %1246  ;;  %2975 = vst [vmem:[#allocation32_spill] sm:$0xff] %v2261_v59  ;;  %2976 = vst [vmem:[#allocation33_spill] sm:$0xff] %v2265_v27 }
  0xf1   :  { %1538 = vpush %v1247_v31  ;;  %2962 = vst [vmem:[#allocation19_spill] sm:$0xff] %v2057_v47  ;;  %v2096_v63 = vrot.slane %v37_v45, %v2057_v47  ;;  %v2131_v14 = vrot.slane %v2092_v61, %v2057_v47  ;;  %v1770_v31 = vmov 7  }
  0xf2   :  { %1540 = vpush %v1260_v30  ;;  %v2909_v30 = vstv %s1985_s23  ;;  %2972 = vst [vmem:[#allocation29_spill] sm:$0xff] %v2228_v57  ;;  %s2245_s21 = spop %1490 }
  0xf3   :  { %1642 = vset.pattern.permute.xlu1 %v1756_v55  ;;  %v2075_v55 = vmul.f32 %v2044_v44, %v60_v41  ;;  %v2185_v41 = vrot.slane %v2145_v19, %v2057_v47  ;;  %v2203_v16 = vmul.f32 %v2044_v44, %v2909_v30  ;;  %v2218_v30 = vrot.slane %v2145_v19, %v2079_v56  ;;  %s2273_s23 = spop %1492 }
  0xf4   :  { %119 = vperm.xlu1 %1642, %v1891_v7   ;;  %v2271_v56 = vmul.f32 %v2044_v44, %v2922_v20  ;;  %v2289_v20 = vrot.slane %v2223_v29, %v2061_v49 }
  0xf5   :  { %2970 = vst [vmem:[#allocation27_spill] sm:$0xff] %v2203_v16 }
  0xf6   :  { %2977 = vst [vmem:[#allocation34_spill] sm:$0xff] %v2271_v56  ;;  %2980 = vst [vmem:[#allocation36_spill] sm:$0xff] %v2289_v20  ;;  %v2983_v20 = vmov 9  }
  0xf8   :  { %1643 = vset.pattern.permute.xlu1 %v1757_v58  ;;  %v703_v58 = vrot.slane %v37_v45, %v2039_v42  ;;  %v781_v42 = vstv %s2207_s26 }
  0xf9   :  { %151 = vperm.xlu1 %1643, %v1896_v8   ;;  %v783_v43 = vmul.f32 %v2034_v40, %v781_v42 }
  0xfd   :  { %v2011_v32 = vpop.permute.xlu1 %697  ;;  %1645 = vset.pattern.permute.xlu1 %v1769_v33  ;;  %v2013_v34 = vpop.permute.xlu0 %693 }
  0xfe   :  { %187 = vperm.xlu1 %1645, %v1896_v8   ;;  %v705_v23 = vadd.f32 %v703_v58, %v2011_v32  ;;  %v704_v32 = vadd.f32 %v703_v58, %v2013_v34  ;;  %v745_v58 = vstv %s2171_s20  ;;  %s2282_s20 = spop %1494 }
  0xff   :  { %s2309_s26 = spop %1496 }
 0x100   :  { %v2275_v47 = vadd.f32 %v712_v26, %v705_v23  ;;  %v2284_v54 = vadd.f32 %v711_v15, %v704_v32  ;;  %v2293_v23 = vrot.slane %v2223_v29, %v2065_v51  ;;  %v748_v32 = vmul.f32 %v2044_v44, %v745_v58  ;;  %s1499_s6 = spop %1498 }
 0x101   :  { %v817_v51 = vstv %s2245_s21  ;;  %v889_v19 = vstv %s1499_s6 }
 0x102   :  { %191 = vperm.xlu1 %1645, %v1891_v7   ;;  %v2023_v37 = vpop.permute.xlu1 %729  ;;  %v2025_v38 = vpop.permute.xlu0 %733  ;;  %2981 = vst [vmem:[#allocation37_spill] sm:$0xff] %v2293_v23  ;;  %v716_v56 = vmul.f32 0.2, %v2275_v47  ;;  %v715_v23 = vmul.f32 0.2, %v2284_v54  ;;  %v2350_v57 = vmul.f32 %v2034_v40, %v889_v19 }
 0x103   :  { %v741_v26 = vadd.f32 %v2087_v60, %v2025_v38  ;;  %v819_v38 = vmul.f32 %v2034_v40, %v817_v51 }
 0x106   :  { %1647 = vset.pattern.permute.xlu1 %v1759_v62 }
 0x107   :  { %227 = vperm.xlu1 %1647, %v1891_v7   ;;  %v2059_v48 = vpop.permute.xlu1 %765  ;;  %v2063_v50 = vpop.permute.xlu0 %801 }
 0x10b   :  { %1648 = vset.pattern.permute.xlu1 %v1760_v3  ;;  %v2102_v1 = vpop.permute.xlu1 %769  ;;  %v2117_v3 = vrot.slane %v37_v45, %v2069_v53  ;;  %v2190_v45 = vmul.f32 %v2034_v40, %v2907_v22  ;;  %v2211_v22 = vrot.slane %v2092_v61, %v2061_v49  ;;  %v740_v53 = vadd.f32 %v2087_v60, %v2023_v37 }
 0x10c   :  { %259 = vperm.xlu1 %1648, %v1896_v8   ;;  %v2111_v5 = vpop.permute.xlu0 %841  ;;  %v2304_v49 = vrot.slane %v2223_v29, %v2067_v52  ;;  %v820_v60 = vmul.f32 %v2044_v44, %v817_v51  ;;  %v2337_v29 = vadd.f32 %v748_v32, %v741_v26  ;;  %v777_v51 = vadd.f32 %v2096_v63, %v2102_v1 }
 0x10d   :  { %v717_v26 = vmax.f32 %v2284_v54, %v715_v23  ;;  %v2358_v1 = vmul.f32 %v2044_v44, %v889_v19 }
 0x10e   :  { %2982 = vst [vmem:[#allocation38_spill] sm:$0xff] %v2304_v49  ;;  %v853_v49 = vstv %s2282_s20  ;;  %v752_v23 = vmul.f32 0.2, %v2337_v29 }
 0x110   :  { %1650 = vset.pattern.permute.xlu1 %v1770_v31  ;;  %v2173_v33 = vpop.permute.xlu1 %805  ;;  %v2921_v31 = vstv %s2015_s9 }
 0x111   :  { %295 = vperm.xlu1 %1650, %v1896_v8   ;;  %v2177_v36 = vpop.permute.xlu0 %909  ;;  %v2256_v34 = vmul.f32 %v2034_v40, %v2921_v31  ;;  %v2279_v31 = vrot.slane %v2092_v61, %v2067_v52  ;;  %v747_v61 = vmul.f32 %v2034_v40, %v745_v58  ;;  %v776_v52 = vadd.f32 %v2096_v63, %v2059_v48 }
 0x112   :  { %v784_v58 = vmul.f32 %v2044_v44, %v781_v42  ;;  %v2335_v42 = vmul.f32 %v2034_v40, %v853_v49  ;;  %v813_v63 = vadd.f32 %v2099_v0, %v2173_v33  ;;  %v1771_v33 = vmov 10  }
 0x113   :  { %2974 = vst [vmem:[#allocation31_spill] sm:$0xff] %v2256_v34  ;;  %2978 = vst [vmem:[#allocation35_spill] sm:$0xff] %v2279_v31  ;;  %v2328_v34 = vadd.f32 %v747_v61, %v740_v53  ;;  %v856_v53 = vmul.f32 %v2044_v44, %v853_v49  ;;  %v718_v61 = vmax.f32 %v2275_v47, %v716_v56 }
 0x114   :  { %v2344_v31 = vadd.f32 %v783_v43, %v776_v52  ;;  %v812_v56 = vadd.f32 %v2099_v0, %v2063_v50  ;;  %v2369_v32 = vadd.f32 %v784_v58, %v777_v51  ;;  %v849_v0 = vadd.f32 %v2105_v2, %v2111_v5 }
 0x115   :  { %299 = vperm.xlu1 %1650, %v1891_v7   ;;  %v2236_v62 = vpop.permute.xlu1 %837  ;;  %v751_v43 = vmul.f32 0.2, %v2328_v34  ;;  %v2383_v51 = vadd.f32 %v820_v60, %v813_v63  ;;  %v920_v5 = vadd.f32 %v2114_v9, %v2177_v36  ;;  %v2984_v63 = vunpack.c.h.bf16 %v2054_v46 }
 0x116   :  { %v2247_v6 = vpop.permute.xlu0 %949  ;;  %v787_v50 = vmul.f32 0.2, %v2344_v31  ;;  %v2388_v59 = vadd.f32 %v819_v38, %v812_v56  ;;  %v788_v60 = vmul.f32 0.2, %v2369_v32  ;;  %v2401_v38 = vadd.f32 %v856_v53, %v849_v0 }
 0x117   :  { %v848_v36 = vadd.f32 %v2105_v2, %v2236_v62 }
 0x118   :  { %v823_v62 = vmul.f32 0.2, %v2388_v59  ;;  %v860_v16 = vmul.f32 0.2, %v2401_v38 }
 0x119   :  { %1652 = vset.pattern.permute.xlu1 %v2979_v10  ;;  %v722_v10 = vstv %s2153_s25  ;;  %s2326_s25 = spop %1500 }
 0x11a   :  { %335 = vperm.xlu1 %1652, %v1891_v7   ;;  %v2300_v15 = vpop.permute.xlu1 %873  ;;  %s1503_s21 = spop %1502  ;;  %v725_v52 = vmul.f32 %v722_v10, %v718_v61 }
 0x11b   :  { %v2313_v37 = vpop.permute.xlu0 %1017  ;;  %s2353_s6 = spop %1504 }
 0x11c   :  { %s1507_s20 = spop %1506  ;;  %v727_v27 = vadd.f32 %v2984_v63, %v725_v52  ;;  %v2986_v52 = vstv %s2194_s8 }
 0x11d   :  { %v961_v47 = vstv %s1507_s20 }
 0x11e   :  { %1653 = vset.pattern.permute.xlu1 %v2983_v20  ;;  %v2331_v11 = vpop.permute.xlu1 %877  ;;  %v925_v20 = vstv %s1503_s21  ;;  %s2373_s21 = spop %1508  ;;  %v2381_v58 = vmul.f32 %v2034_v40, %v961_v47 }
 0x11f   :  { %367 = vperm.xlu1 %1653, %v1896_v8   ;;  %v927_v49 = vmul.f32 %v2034_v40, %v925_v20  ;;  %v2366_v54 = vmul.f32 %v2044_v44, %v925_v20  ;;  %v724_v20 = vmul.f32 %v722_v10, %v717_v26  ;;  %s1511_s9 = spop %1510  ;;  %v754_v26 = vmax.f32 %v2337_v29, %v752_v23 }
 0x120   :  { %v2346_v48 = vpop.permute.xlu0 %1057  ;;  %v997_v25 = vstv %s1511_s9  ;;  %s2395_s20 = spop %1512  ;;  %v824_v23 = vmul.f32 0.2, %v2383_v51  ;;  %v790_v10 = vmax.f32 %v2369_v32, %v788_v60  ;;  %v884_v60 = vadd.f32 %v2123_v12, %v2300_v15 }
 0x121   :  { %s1515_s9 = spop %1514  ;;  %v2411_v56 = vmul.f32 %v2034_v40, %v997_v25  ;;  %v2422_v2 = vadd.f32 %v927_v49, %v920_v5  ;;  %v2439_v49 = vadd.f32 %v2335_v42, %v848_v36  ;;  %v2990_v5 = vmov 11  }
 0x122   :  { %s2420_s29 = spop %1516  ;;  %v825_v42 = vmax.f32 %v2388_v59, %v823_v62  ;;  %v2993_v62 = vstv %s2273_s23 }
 0x123   :  { %1655 = vset.pattern.permute.xlu1 %v1771_v33  ;;  %v2371_v19 = vpop.permute.xlu1 %913  ;;  %v753_v33 = vmax.f32 %v2328_v34, %v751_v43  ;;  %v789_v34 = vmax.f32 %v2344_v31, %v787_v50  ;;  %v1033_v31 = vstv %s1515_s9  ;;  %v2417_v50 = vmul.f32 %v2044_v44, %v997_v25  ;;  %s1519_s9 = spop %1518 }
 0x124   :  { %403 = vperm.xlu1 %1655, %v1896_v8   ;;  %v964_v8 = vmul.f32 %v2044_v44, %v961_v47  ;;  %v2985_v47 = vunpack.c.l.bf16 %v2054_v46  ;;  %v2989_v25 = vstv %s2232_s0  ;;  %v2435_v18 = vmul.f32 %v2034_v40, %v1033_v31  ;;  %s2446_s8 = spop %1520 }
 0x125   :  { %v2385_v61 = vpop.permute.xlu0 %1125  ;;  %v760_v53 = vmul.f32 %v2986_v52, %v753_v33  ;;  %v957_v33 = vadd.f32 %v2117_v3, %v2247_v6  ;;  %v826_v6 = vmax.f32 %v2383_v51, %v824_v23  ;;  %v1069_v36 = vstv %s1519_s9  ;;  %s1523_s27 = spop %1522 }
 0x126   :  { %v726_v43 = vadd.f32 %v2985_v47, %v724_v20  ;;  %v2988_v20 = vmov %v2986_v52  ;;  %v796_v52 = vmul.f32 %v2989_v25, %v789_v34  ;;  %v1105_v51 = vstv %s1523_s27  ;;  %s2464_s1 = spop %1524 }
 0x127   :  { %v761_v63 = vmul.f32 %v2988_v20, %v754_v26  ;;  %v2443_v26 = vmul.f32 %v2044_v44, %v1033_v31  ;;  %v931_v31 = vmul.f32 0.2, %v2422_v2  ;;  %v2458_v23 = vadd.f32 %v964_v8, %v957_v33 }
 0x128   :  { %407 = vperm.xlu1 %1655, %v1891_v7   ;;  %v2406_v29 = vpop.permute.xlu1 %945  ;;  %v762_v20 = vadd.f32 %v760_v53, %v726_v43  ;;  %v2462_v43 = vmul.f32 %v2034_v40, %v1069_v36  ;;  %v859_v59 = vmul.f32 0.2, %v2439_v49  ;;  %v2476_v8 = vadd.f32 %v2350_v57, %v884_v60  ;;  %v2493_v57 = vld [vmem:[%s2897_s2] sm:$0xff] }
 0x129   :  { %v763_v25 = vadd.f32 %v761_v63, %v727_v27  ;;  %v2470_v27 = vmul.f32 %v2044_v44, %v1069_v36  ;;  %v833_v63 = vmul.f32 %v2993_v62, %v826_v6  ;;  %v2995_v33 = vmov %v2993_v62 }
 0x12a   :  { %v2424_v0 = vpop.permute.xlu0 %1165  ;;  %v798_v15 = vadd.f32 %v796_v52, %v762_v20  ;;  %v832_v52 = vmul.f32 %v2995_v33, %v825_v42  ;;  %v933_v20 = vmax.f32 %v2422_v2, %v931_v31  ;;  %v2485_v36 = vmul.f32 %v2034_v40, %v1105_v51 }
 0x12b   :  { %2987 = vst [vmem:[#allocation39_spill] sm:$0xff] %v2424_v0  ;;  %v968_v2 = vmul.f32 0.2, %v2458_v23  ;;  %v1028_v42 = vadd.f32 %v2127_v13, %v2313_v37  ;;  %v861_v33 = vmax.f32 %v2439_v49, %v859_v59  ;;  %v1772_v49 = vmov 13  }
 0x12c   :  { %1657 = vset.pattern.permute.xlu1 %v2990_v5  ;;  %v2991_v5 = vstv %s2232_s0  ;;  %s1527_s0 = spop %1526  ;;  %v834_v31 = vadd.f32 %v832_v52, %v798_v15  ;;  %v885_v52 = vadd.f32 %v2123_v12, %v2331_v11 }
 0x12d   :  { %443 = vperm.xlu1 %1657, %v1891_v7   ;;  %v2452_v34 = vpop.permute.xlu1 %981  ;;  %v797_v47 = vmul.f32 %v2991_v5, %v790_v10  ;;  %v862_v7 = vmax.f32 %v2401_v38, %v860_v16  ;;  %v2994_v16 = vmov 12   ;;  %v2488_v5 = vmul.f32 %v2044_v44, %v1105_v51  ;;  %s2496_s23 = spop %1528 }
 0x12e   :  { %v1141_v60 = vstv %s1527_s0  ;;  %v2997_v51 = vstv %s2309_s26  ;;  %s1531_s27 = spop %1530 }
 0x12f   :  { %v2467_v53 = vpop.permute.xlu0 %1233  ;;  %2996 = vst [vmem:[#allocation41_spill] sm:$0xff] %v2488_v5  ;;  %v799_v6 = vadd.f32 %v797_v47, %v763_v25  ;;  %v869_v62 = vmul.f32 %v2997_v51, %v862_v7  ;;  %v895_v47 = vmul.f32 0.2, %v2476_v8  ;;  %v2998_v5 = vstv %s2353_s6  ;;  %s2518_s0 = spop %1532 }
 0x130   :  { %2992 = vst [vmem:[#allocation40_spill] sm:$0xff] %v2467_v53  ;;  %v1177_v53 = vstv %s1531_s27  ;;  %v2509_v0 = vmul.f32 %v2998_v5, %v933_v20  ;;  %v2512_v37 = vmul.f32 %v2034_v40, %v1141_v60  ;;  %v2515_v15 = vmul.f32 %v2044_v44, %v1141_v60  ;;  %s1535_s9 = spop %1534  ;;  %s3078_s27 = sld [smem:[#allocation16_spill]] }
 0x131   :  { %1658 = vset.pattern.permute.xlu1 %v2994_v16  ;;  %v2479_v38 = vpop.permute.xlu1 %985  ;;  %v1118_v16 = vstv %s2464_s1  ;;  %v835_v32 = vadd.f32 %v833_v63, %v799_v6  ;;  %v1154_v7 = vstv %s2496_s23  ;;  %v970_v63 = vmax.f32 %v2458_v23, %v968_v2  ;;  %s2551_s26 = spop %1536 }
 0x132   :  { %475 = vperm.xlu1 %1658, %v2493_v57   ;;  %v2999_v5 = vmov %v2997_v51  ;;  %v2531_v60 = vmul.f32 %v2034_v40, %v1177_v53  ;;  %v2534_v51 = vmul.f32 %v2044_v44, %v1177_v53  ;;  %v1065_v23 = vadd.f32 %v2131_v14, %v2346_v48 }
 0x133   :  { %v868_v6 = vmul.f32 %v2999_v5, %v861_v33  ;;  %v897_v2 = vmax.f32 %v2476_v8, %v895_v47  ;;  %v2540_v11 = vadd.f32 %v869_v62, %v835_v32  ;;  %v921_v33 = vadd.f32 %v2114_v9, %v2371_v19  ;;  %v1684_v9 = vld [vmem:[%s2897_s2 + $0x8] sm:$0xff]  ;;  %s2574_s2 = spop %1538 }
 0x134   :  { %v50_v10 = vpop.permute.xlu0 %49  ;;  %v956_v53 = vadd.f32 %v2117_v3, %v2406_v29  ;;  %v894_v32 = vadd.f32 %v2358_v1, %v885_v52  ;;  %v1074_v29 = vadd.f32 %v2470_v27, %v1065_v23  ;;  %v992_v47 = vadd.f32 %v2157_v24, %v2452_v34  ;;  %s2707_s1 = spop %1540 }
 0x135   :  { %v57_v25 = vadd.f32 %v2181_v39, %v50_v10  ;;  %v1037_v10 = vadd.f32 %v2435_v18, %v1028_v42  ;;  %v1213_v42 = vstv %s1535_s9  ;;  %v870_v3 = vadd.f32 %v868_v6, %v834_v31 }
 0x136   :  { %1660 = vset.pattern.permute.xlu1 %v1772_v49  ;;  %v2520_v59 = vpop.permute.xlu1 %1021  ;;  %v3000_v49 = vstv %s2373_s21  ;;  %v3001_v5 = vstv %s2326_s25  ;;  %v2567_v1 = vmul.f32 %v2044_v44, %v1213_v42  ;;  %v3002_v52 = vstv %s1952_s11 }
 0x137   :  { %v65_v20 = vadd.f32 %v2075_v55, %v57_v25  ;;  %511 = vperm.xlu1 %1660, %v2493_v57   ;;  %v2549_v48 = vmul.f32 %v3000_v49, %v970_v63  ;;  %v1039_v8 = vmul.f32 0.2, %v1037_v10  ;;  %v2564_v49 = vmul.f32 %v2034_v40, %v1213_v42 }
 0x138   :  { %v930_v31 = vadd.f32 %v2366_v54, %v921_v33  ;;  %v965_v27 = vadd.f32 %v2381_v58, %v956_v53  ;;  %v896_v18 = vmul.f32 0.2, %v894_v32  ;;  %v1076_v54 = vmul.f32 0.2, %v1074_v29 }
 0x139   :  { %v67_v55 = vmul.f32 0.2, %v65_v20  ;;  %v116_v12 = vpop.permute.xlu0 %115  ;;  %v1041_v34 = vmax.f32 %v1037_v10, %v1039_v8  ;;  %v1249_v33 = vstv %s2574_s2  ;;  %v1001_v58 = vadd.f32 %v2411_v56, %v992_v47 }
 0x13a   :  { %v126_v25 = vadd.f32 %v2185_v41, %v116_v12  ;;  %v904_v12 = vmul.f32 %v3001_v5, %v897_v2  ;;  %v993_v5 = vadd.f32 %v2157_v24, %v2479_v38  ;;  %v3006_v47 = vstv %s2420_s29 }
 0x13b   :  { %v69_v62 = vmax.f32 %v65_v20, %v67_v55  ;;  %515 = vperm.xlu1 %1660, %v1684_v9   ;;  %v1054_v19 = vpop.permute.xlu1 %1053  ;;  %v1226_v55 = vstv %s2551_s26  ;;  %v1078_v24 = vmax.f32 %v1074_v29, %v1076_v54  ;;  %s3075_s26 = sld [smem:[#allocation14_spill]] }
 0x13c   :  { %v135_v63 = vadd.f32 %v2150_v21, %v126_v25  ;;  %v3003_v21 = vunpack.c.h.bf16 %v2054_v46  ;;  %v3004_v25 = vmov 14   ;;  %v906_v8 = vadd.f32 %v904_v12, %v870_v3 }
 0x13d   :  { %v75_v20 = vmul.f32 %v3002_v52, %v69_v62  ;;  %v1136_v62 = vadd.f32 %v2136_v17, %v2385_v61  ;;  %v1064_v56 = vadd.f32 %v2131_v14, %v1054_v19  ;;  %v898_v3 = vmax.f32 %v894_v32, %v896_v18 }
 0x13e   :  { %v137_v6 = vmul.f32 0.2, %v135_v63  ;;  %v156_v23 = vpop.permute.xlu0 %155  ;;  %v1029_v61 = vadd.f32 %v2127_v13, %v2520_v59  ;;  %v2606_v18 = vmul.f32 %v2034_v40, %v1249_v33  ;;  %v1002_v59 = vadd.f32 %v2417_v50, %v993_v5 }
 0x13f   :  { %v2578_v2 = vadd.f32 %v3003_v21, %v75_v20  ;;  %v163_v42 = vadd.f32 %v2198_v4, %v156_v23  ;;  %1662 = vset.pattern.permute.xlu1 %v3004_v25  ;;  %v932_v20 = vmul.f32 0.2, %v930_v31  ;;  %v967_v23 = vmul.f32 0.2, %v965_v27 }
 0x140   :  { %v139_v53 = vmax.f32 %v135_v63, %v137_v6  ;;  %551 = vperm.xlu1 %1662, %v1684_v9   ;;  %v1090_v10 = vpop.permute.xlu1 %1089  ;;  %v3005_v21 = vstv %s1964_s16  ;;  %v2596_v9 = vmul.f32 %v3006_v47, %v1041_v34  ;;  %v2609_v13 = vadd.f32 %v2512_v37, %v1136_v62 }
 0x141   :  { %v172_v52 = vadd.f32 %v2167_v28, %v163_v42  ;;  %v1003_v28 = vmul.f32 0.2, %v1001_v58  ;;  %v1100_v38 = vadd.f32 %v2211_v22, %v1090_v10  ;;  %v3007_v42 = vmov 15  }
 0x142   :  { %v2591_v25 = vmul.f32 %v3005_v21, %v139_v53  ;;  %v934_v19 = vmax.f32 %v930_v31, %v932_v20  ;;  %v969_v29 = vmax.f32 %v965_v27, %v967_v23  ;;  %v1073_v34 = vadd.f32 %v2462_v43, %v1064_v56 }
 0x143   :  { %v174_v63 = vmul.f32 0.2, %v172_v52  ;;  %v224_v12 = vpop.permute.xlu0 %223  ;;  %v3008_v53 = vstv %s2326_s25  ;;  %v942_v21 = vadd.f32 %v2509_v0, %v906_v8  ;;  %v1038_v37 = vadd.f32 %v2443_v26, %v1029_v61 }
 0x144   :  { %v234_v6 = vadd.f32 %v2218_v30, %v224_v12  ;;  %1663 = vset.pattern.permute.xlu1 %v3007_v42  ;;  %v1094_v14 = vpop.permute.xlu1 %1093  ;;  %v905_v10 = vmul.f32 %v3008_v53, %v898_v3  ;;  %v3009_v62 = vstv %s1972_s18  ;;  %v3010_v50 = vstv %s2446_s8  ;;  %v3013_v12 = vld [vmem:[#allocation27_spill] sm:$0xff] }
 0x145   :  { %v176_v32 = vmax.f32 %v172_v52, %v174_v63  ;;  %583 = vperm.xlu1 %1663, %v2493_v57   ;;  %v2625_v5 = vmul.f32 %v3010_v50, %v1078_v24  ;;  %v1005_v57 = vmax.f32 %v1001_v58, %v1003_v28  ;;  %v1109_v31 = vadd.f32 %v2485_v36, %v1100_v38  ;;  %v3014_v38 = vld [vmem:[#allocation39_spill] sm:$0xff] }
 0x146   :  { %v243_v54 = vadd.f32 %v2190_v45, %v234_v6  ;;  %v1147_v45 = vmul.f32 0.2, %v2609_v13  ;;  %v1004_v52 = vmul.f32 0.2, %v1002_v59  ;;  %v1101_v0 = vadd.f32 %v2211_v22, %v1094_v14  ;;  %v3015_v6 = vld [vmem:[#allocation24_spill] sm:$0xff] }
 0x147   :  { %v2621_v47 = vmul.f32 %v3009_v62, %v176_v32  ;;  %v3011_v20 = vstv %s2353_s6  ;;  %v3012_v56 = vstv %s2373_s21  ;;  %v1075_v61 = vmul.f32 0.2, %v1073_v34  ;;  %s3063_s6 = sld [smem:[#allocation43_spill]] }
 0x148   :  { %v245_v43 = vmul.f32 0.2, %v243_v54  ;;  %v264_v27 = vpop.permute.xlu0 %263  ;;  %v941_v23 = vmul.f32 %v3011_v20, %v934_v19  ;;  %v976_v3 = vmul.f32 %v3012_v56, %v969_v29  ;;  %v907_v36 = vadd.f32 %v905_v10, %v2540_v11  ;;  %s3065_s21 = sld [smem:[#allocation9_spill]] }
 0x149   :  { %v271_v26 = vadd.f32 %v2251_v35, %v264_v27  ;;  %v1130_v8 = vpop.permute.xlu1 %1129  ;;  %v1040_v63 = vmul.f32 0.2, %v1038_v37  ;;  %v1173_v42 = vadd.f32 %v3015_v6, %v3014_v38  ;;  %v3016_v22 = vstv %s2395_s20  ;;  %v3022_v38 = vld [vmem:[#allocation29_spill] sm:$0xff]  ;;  %s3066_s20 = sld [smem:[#allocation10_spill]] }
 0x14a   :  { %v247_v58 = vmax.f32 %v243_v54, %v245_v43  ;;  %v1137_v28 = vadd.f32 %v2136_v17, %v1130_v8  ;;  %v1012_v14 = vmul.f32 %v3016_v22, %v1005_v57  ;;  %v1111_v32 = vmul.f32 0.2, %v1109_v31  ;;  %v3018_v54 = vld [vmem:[#allocation41_spill] sm:$0xff] }
 0x14b   :  { %v280_v24 = vadd.f32 %v3013_v12, %v271_v26  ;;  %v3017_v53 = vstv %s1983_s22  ;;  %v1149_v19 = vmax.f32 %v2609_v13, %v1147_v45  ;;  %v1006_v29 = vmax.f32 %v1002_v59, %v1004_v52  ;;  %v3019_v26 = vld [vmem:[#allocation32_spill] sm:$0xff]  ;;  %v3021_v52 = vld [vmem:[#allocation26_spill] sm:$0xff] }
 0x14c   :  { %v2644_v62 = vmul.f32 %v3017_v53, %v247_v58  ;;  %v1110_v50 = vadd.f32 %v3018_v54, %v1101_v0  ;;  %v943_v43 = vadd.f32 %v941_v23, %v907_v36  ;;  %v978_v17 = vadd.f32 %v976_v3, %v942_v21  ;;  %v3020_v45 = vld [vmem:[#allocation40_spill] sm:$0xff] }
 0x14d   :  { %v282_v11 = vmul.f32 0.2, %v280_v24  ;;  %v332_v10 = vpop.permute.xlu0 %331  ;;  %v1077_v27 = vmax.f32 %v1073_v34, %v1075_v61  ;;  %v1042_v20 = vmax.f32 %v1038_v37, %v1040_v63  ;;  %v1146_v58 = vadd.f32 %v2515_v15, %v1137_v28 }
 0x14e   :  { %v342_v8 = vadd.f32 %v3019_v26, %v332_v10  ;;  %v1162_v57 = vpop.permute.xlu1 %1161  ;;  %v1014_v59 = vadd.f32 %v1012_v14, %v978_v17  ;;  %v1244_v0 = vadd.f32 %v3021_v52, %v3020_v45  ;;  %v1113_v12 = vmax.f32 %v1109_v31, %v1111_v32  ;;  %v3028_v10 = vld [vmem:[#allocation35_spill] sm:$0xff] }
 0x14f   :  { %v284_v56 = vmax.f32 %v280_v24, %v282_v11  ;;  %v1172_v13 = vadd.f32 %v3015_v6, %v1162_v57  ;;  %v3023_v21 = vmov %v3016_v22  ;;  %v1112_v3 = vmul.f32 0.2, %v1110_v50 }
 0x150   :  { %v351_v23 = vadd.f32 %v3022_v38, %v342_v8  ;;  %v1013_v34 = vmul.f32 %v3023_v21, %v1006_v29  ;;  %v3024_v61 = vstv %s1989_s24  ;;  %v2662_v15 = vadd.f32 %v2534_v51, %v1173_v42  ;;  %v3027_v29 = vld [vmem:[#allocation33_spill] sm:$0xff]  ;;  %v3029_v8 = vld [vmem:[#allocation30_spill] sm:$0xff] }
 0x151   :  { %v2658_v36 = vmul.f32 %v3024_v61, %v284_v56  ;;  %v1181_v37 = vadd.f32 %v2531_v60, %v1172_v13  ;;  %v979_v63 = vadd.f32 %v2549_v48, %v943_v43  ;;  %v3025_v24 = vstv %s2446_s8  ;;  %s3070_s8 = sld [smem:[#allocation12_spill]] }
 0x152   :  { %v1084_v28 = vmul.f32 %v3025_v24, %v1077_v27  ;;  %v353_v6 = vmul.f32 0.2, %v351_v23  ;;  %v372_v31 = vpop.permute.xlu0 %371  ;;  %v3026_v22 = vstv %s2420_s29  ;;  %v1148_v32 = vmul.f32 0.2, %v1146_v58  ;;  %s3057_s29 = sld [smem:[#allocation6_spill]] }
 0x153   :  { %v1049_v14 = vmul.f32 %v3026_v22, %v1042_v20  ;;  %v1183_v53 = vmul.f32 0.2, %v1181_v37  ;;  %v379_v54 = vadd.f32 %v3027_v29, %v372_v31  ;;  %v1198_v11 = vpop.permute.xlu1 %1197  ;;  %v1050_v60 = vadd.f32 %v2596_v9, %v1014_v59  ;;  %v3033_v31 = vld [vmem:[#allocation31_spill] sm:$0xff] }
 0x154   :  { %v1120_v51 = vmul.f32 %v1118_v16, %v1113_v12  ;;  %v355_v42 = vmax.f32 %v351_v23, %v353_v6  ;;  %v1208_v48 = vadd.f32 %v3028_v10, %v1198_v11  ;;  %v2675_v43 = vadd.f32 %v2606_v18, %v1244_v0 }
 0x155   :  { %v1015_v17 = vadd.f32 %v1013_v34, %v979_v63  ;;  %v1114_v27 = vmax.f32 %v1110_v50, %v1112_v3  ;;  %v388_v57 = vadd.f32 %v3029_v8, %v379_v54  ;;  %v1086_v20 = vadd.f32 %v1084_v28, %v1050_v60  ;;  %v3031_v3 = vld [vmem:[#allocation36_spill] sm:$0xff] }
 0x156   :  { %v3030_v56 = vstv %s1999_s28  ;;  %v1185_v45 = vmax.f32 %v1181_v37, %v1183_v53  ;;  %v1217_v9 = vadd.f32 %v2564_v49, %v1208_v48  ;;  %v1156_v59 = vmul.f32 %v1154_v7, %v1149_v19  ;;  %v3035_v48 = vld [vmem:[#allocation37_spill] sm:$0xff] }
 0x157   :  { %v2680_v13 = vmul.f32 %v3030_v56, %v355_v42  ;;  %v1051_v12 = vadd.f32 %v1049_v14, %v1015_v17  ;;  %v1150_v38 = vmax.f32 %v1146_v58, %v1148_v32  ;;  %v390_v18 = vmul.f32 0.2, %v388_v57  ;;  %v1202_v0 = vpop.permute.xlu1 %1201  ;;  %v440_v50 = vpop.permute.xlu0 %439 }
 0x158   :  { %v1122_v23 = vadd.f32 %v1120_v51, %v1086_v20  ;;  %v1219_v21 = vmul.f32 0.2, %v1217_v9  ;;  %v1209_v34 = vadd.f32 %v3028_v10, %v1202_v0  ;;  %v450_v61 = vadd.f32 %v3031_v3, %v440_v50 }
 0x159   :  { %v1184_v37 = vmul.f32 0.2, %v2662_v15  ;;  %v1255_v49 = vmul.f32 0.2, %v2675_v43  ;;  %v1121_v19 = vmul.f32 %v1118_v16, %v1114_v27  ;;  %v392_v58 = vmax.f32 %v388_v57, %v390_v18 }
 0x15a   :  { %v3032_v63 = vstv %s2518_s0  ;;  %v1221_v28 = vmax.f32 %v1217_v9, %v1219_v21  ;;  %v1218_v6 = vadd.f32 %v2567_v1, %v1209_v34  ;;  %v459_v22 = vadd.f32 %v3033_v31, %v450_v61  ;;  %s3074_s0 = sld [smem:[#allocation13_spill]] }
 0x15b   :  { %v1192_v24 = vmul.f32 %v3032_v63, %v1185_v45  ;;  %v1252_v14 = vmul.f32 %v2044_v44, %v1249_v33  ;;  %v1087_v32 = vadd.f32 %v2625_v5, %v1051_v12  ;;  %v1157_v53 = vmul.f32 %v1154_v7, %v1150_v38 }
 0x15c   :  { %v3034_v54 = vstv %s2005_s30  ;;  %v1228_v16 = vmul.f32 %v1226_v55, %v1221_v28  ;;  %v1220_v60 = vmul.f32 0.2, %v1218_v6  ;;  %v461_v51 = vmul.f32 0.2, %v459_v22  ;;  %v1238_v42 = vpop.permute.xlu1 %1237  ;;  %v480_v1 = vpop.permute.xlu0 %479  ;;  %v3042_v28 = vld [vmem:[#allocation25_spill] sm:$0xff] }
 0x15d   :  { %v2703_v11 = vmul.f32 %v3034_v54, %v392_v58  ;;  %v1158_v10 = vadd.f32 %v1156_v59, %v1122_v23  ;;  %v1186_v33 = vmax.f32 %v2662_v15, %v1184_v37  ;;  %v1123_v7 = vadd.f32 %v1121_v19, %v1087_v32  ;;  %v3036_v59 = vld [vmem:[#allocation34_spill] sm:$0xff]  ;;  %v3043_v32 = vld [vmem:[#allocation21_spill] sm:$0xff] }
 0x15e   :  { %v1245_v5 = vadd.f32 %v3021_v52, %v1238_v42  ;;  %v487_v17 = vadd.f32 %v3035_v48, %v480_v1  ;;  %v1257_v27 = vmax.f32 %v2675_v43, %v1255_v49  ;;  %v1222_v8 = vmax.f32 %v1218_v6, %v1220_v60  ;;  %v3040_v58 = vld [vmem:[#allocation38_spill] sm:$0xff] }
 0x15f   :  { %v463_v57 = vmax.f32 %v459_v22, %v461_v51  ;;  %v1194_v20 = vadd.f32 %v1192_v24, %v1158_v10  ;;  %v504_v56 = vstv %s2030_s7  ;;  %v1159_v45 = vadd.f32 %v1157_v53, %v1123_v7  ;;  %v3041_v24 = vld [vmem:[#allocation18_spill] sm:$0xff]  ;;  %v3044_v53 = vld [vmem:[#allocation28_spill] sm:$0xff] }
 0x160   :  { %v1254_v9 = vadd.f32 %v1252_v14, %v1245_v5  ;;  %v496_v12 = vadd.f32 %v3036_v59, %v487_v17  ;;  %v3037_v38 = vstv %s2046_s5  ;;  %v1262_v18 = vstv %s2707_s1  ;;  %v3045_v60 = vld [vmem:[#allocation22_spill] sm:$0xff] }
 0x161   :  { %v565_v15 = vmul.f32 %v2034_v40, %v3037_v38  ;;  %v3038_v0 = vstv %s2018_s14  ;;  %v1230_v52 = vadd.f32 %v1228_v16, %v1194_v20  ;;  %v3039_v23 = vmov %v3032_v63  ;;  %v45_v37 = vpop.permute.xlu1 %44  ;;  %v548_v49 = vpop.permute.xlu0 %547 }
 0x162   :  { %v2721_v50 = vmul.f32 %v3038_v0, %v463_v57  ;;  %v1193_v21 = vmul.f32 %v3039_v23, %v1186_v33  ;;  %v1229_v43 = vmul.f32 %v1226_v55, %v1222_v8  ;;  %v1256_v34 = vmul.f32 0.2, %v1254_v9 }
 0x163   :  { %v498_v61 = vmul.f32 0.2, %v496_v12  ;;  %v56_v19 = vadd.f32 %v2181_v39, %v45_v37  ;;  %v558_v63 = vadd.f32 %v3040_v58, %v548_v49  ;;  %v89_v6 = vrot.slane %v3042_v28, %v3041_v24 }
 0x164   :  { %v1264_v31 = vmul.f32 %v1262_v18, %v1257_v27  ;;  %v1258_v22 = vmax.f32 %v1254_v9, %v1256_v34  ;;  %v2733_v55 = vrot.slane %v3044_v53, %v3043_v32  ;;  %v1195_v54 = vadd.f32 %v1193_v21, %v1159_v45 }
 0x165   :  { %v500_v14 = vmax.f32 %v496_v12, %v498_v61  ;;  %v599_v16 = vstv %s2082_s10  ;;  %v64_v51 = vadd.f32 %v3045_v60, %v56_v19  ;;  %v567_v42 = vadd.f32 %v565_v15, %v558_v63  ;;  %s1776_s10 = smov [#allocation2]  }
 0x166   :  { %v2737_v39 = vadd.f32 %v1264_v31, %v1230_v52  ;;  %v1231_v10 = vadd.f32 %v1229_v43, %v1195_v54  ;;  %v1265_v33 = vmul.f32 %v1262_v18, %v1258_v22  ;;  %v3046_v7 = vstv %s1954_s12  ;;  %v80_v8 = vpop.permute.xlu1 %79  ;;  %v588_v57 = vpop.permute.xlu0 %587 }
 0x167   :  { %v2741_v1 = vmul.f32 %v504_v56, %v500_v14  ;;  %v97_v5 = vmul.f32 %v2034_v40, %v3046_v7  ;;  %v66_v17 = vmul.f32 0.2, %v64_v51  ;;  %v569_v27 = vmul.f32 0.2, %v567_v42 }
 0x168   :  { %v602_v20 = vmul.f32 %v2044_v44, %v599_v16  ;;  %v90_v45 = vadd.f32 %v89_v6, %v80_v8  ;;  %v595_v9 = vadd.f32 %v2733_v55, %v588_v57  ;;  %v2750_v59 = vadd.f32 %v1265_v33, %v1231_v10 }
 0x169   :  { %v68_v12 = vmax.f32 %v64_v51, %v66_v17  ;;  %v571_v38 = vmax.f32 %v567_v42, %v569_v27  ;;  %v1268_v15 = vsel %vm618_vm0, %v2737_v39, -inf  ;;  %v576_v18 = vstv %s2077_s3  ;;  %s3085_s3 = sld [smem:[#allocation44_spill]] }
 0x16a   :  { %v99_v0 = vadd.f32 %v97_v5, %v90_v45  ;;  %v604_v52 = vadd.f32 %v602_v20, %v595_v9  ;;  %1269 = vmax.xlane.f32.xlu1 %v1268_v15  ;;  %v1271_v23 = vsel %vm618_vm0, %v2750_v59, -inf  ;;  %v3047_v21 = vmov %v3046_v7  ;;  %v84_v61 = vpop.permute.xlu1 %83 }
 0x16b   :  { %v98_v43 = vmul.f32 %v2044_v44, %v3047_v21  ;;  %v2762_v34 = vmul.f32 %v576_v18, %v571_v38  ;;  %1272 = vmax.xlane.f32.xlu0 %v1271_v23  ;;  %v3048_v37 = vstv %s1952_s11  ;;  %v91_v24 = vadd.f32 %v89_v6, %v84_v61  ;;  %v3052_v23 = vld [vmem:[#allocation20_spill] sm:$0xff] }
 0x16c   :  { %v74_v49 = vmul.f32 %v3048_v37, %v68_v12  ;;  %v101_v19 = vmul.f32 0.2, %v99_v0  ;;  %v606_v63 = vmul.f32 0.2, %v604_v52  ;;  %v108_v53 = vstv %s1958_s13  ;;  %s3053_s13 = sld [smem:[#allocation42_spill]] }
 0x16d   :  { %v100_v14 = vadd.f32 %v98_v43, %v91_v24  ;;  %v612_v54 = vstv %s2108_s4  ;;  %v3049_v60 = vunpack.c.l.bf16 %v2054_v46  ;;  %v3050_v5 = vstv %s1962_s15  ;;  %s3055_s15 = sld [smem:[#allocation5_spill]]  ;;  %s1372_s4 = sshll.u32 %s1776_s10, 4  ;;  %s1373_s4 = int_to_ptr.vmem [resolvable:$true] %s1372_s4 }
 0x16e   :  { %v103_v31 = vmax.f32 %v99_v0, %v101_v19  ;;  %v608_v22 = vmax.f32 %v604_v52, %v606_v63  ;;  %v134_v17 = vmul.f32 %v2044_v44, %v3050_v5  ;;  %v3051_v12 = vstv %s1968_s17  ;;  %s3056_s17 = smov 112   ;;  %s1688_s9 = scalar_lea.vmem %s1373_s4, 128 }
 0x16f   :  { %v76_v51 = vadd.f32 %v3049_v60, %v74_v49  ;;  %v102_v10 = vmul.f32 0.2, %v100_v14  ;;  %v120_v33 = vpop.permute.xlu1 %119  ;;  %v169_v38 = vmul.f32 %v2034_v40, %v3051_v12  ;;  %v203_v43 = vstv %s1974_s19  ;;  %p1689_p0 = scmp.ne.s32.totalorder %s1373_s4, %s1688_s9  ;;  %p1693_p1 = scmp.lt.s32.totalorder %s1373_s4, %s1373_s4 }
 0x170   :  { %v110_v42 = vmul.f32 %v108_v53, %v103_v31  ;;  %v2772_v7 = vmul.f32 %v612_v54, %v608_v22  ;;  %v127_v6 = vadd.f32 %v2185_v41, %v120_v33  ;;  %v197_v41 = vrot.slane %v3042_v28, %v3052_v23  ;;  %p1694_p2 = scmp.lt.s32.totalorder %s1688_s9, %s1688_s9 }
 0x171   :  { %v104_v8 = vmax.f32 %v100_v14, %v102_v10  ;;  %v3054_v61 = vstv %s1964_s16  ;;  %v1773_v63 = vmov 0.0   ;;  %v3058_v14 = vstv %s1972_s18  ;;  %s3059_s16 = sld [smem:[#allocation7_spill]] }
 0x172   :  { %v112_v27 = vadd.f32 %v110_v42, %v76_v51  ;;  %v136_v57 = vadd.f32 %v134_v17, %v127_v6  ;;  %v1666_v21 = vld [vmem:[%s3053_s13] sm:$0xff]   ;;  %1408 = vmatprep.subr.bf16.mxu1 %v1773_v63  ;;  %1402 = vmatprep.subr.bf16.mxu0 %v1773_v63  ;;  %v206_v51 = vmul.f32 %v2044_v44, %v203_v43  ;;  %s3061_s18 = sld [smem:[#allocation8_spill]]  ;;  %p1695_p3 = por %p1694_p2, %p1693_p1 }
 0x173   :  { %v111_v20 = vmul.f32 %v108_v53, %v104_v8  ;;  %1403 = vmatpush3.bf16.msra.mxu0 %v1666_v21  ;;  %v216_v6 = vstv %s3055_s15  ;;  %1410 = vmatprep.mubr.msk.bf16.mxu1 %vm1774_vm1, %v1773_v63 }
 0x174   :  { %v148_v46 = vadd.f32 %v2591_v25, %v112_v27  ;;  %v138_v45 = vmul.f32 0.2, %v136_v57  ;;  %v152_v9 = vpop.permute.xlu1 %151  ;;  %1404 = vmatprep.mubr.msk.bf16.mxu0 %vm1774_vm1, %v1773_v63  ;;  %p1696_p4 = pnand %p1695_p3, %p1689_p0 }
 0x175   :  { %v113_v15 = vadd.f32 %v111_v20, %v2578_v2  ;;  %v162_v0 = vadd.f32 %v2198_v4, %v152_v9  ;;  %v205_v4 = vmul.f32 %v2034_v40, %v203_v43  ;;  %v3060_v20 = vstv %s3057_s29 }
 0x176   :  { %v140_v52 = vmax.f32 %v136_v57, %v138_v45  ;;  %v242_v45 = vmul.f32 %v2044_v44, %v3060_v20 }
 0x177   :  { %v171_v25 = vadd.f32 %v169_v38, %v162_v0  ;;  %v3062_v23 = vstv %s3059_s16 }
 0x178   :  { %v147_v37 = vmul.f32 %v3054_v61, %v140_v52 }
 0x179   :  { %v173_v49 = vmul.f32 0.2, %v171_v25  ;;  %v188_v19 = vpop.permute.xlu1 %187 }
 0x17a   :  { %v149_v2 = vadd.f32 %v147_v37, %v113_v15  ;;  %v198_v24 = vadd.f32 %v197_v41, %v188_v19 }
 0x17b   :  { %1289 = vrot.lane.b32.xlu1 %v1666_v21, %s3056_s17  ;;  %v175_v28 = vmax.f32 %v171_v25, %v173_v49  ;;  %v1685_v25 = vld [vmem:[%s3063_s6] sm:$0xff]  ;;  %v3064_v49 = vstv %s1983_s22  ;;  %s3068_s22 = sld [smem:[#allocation11_spill]] }
 0x17c   :  { %v207_v31 = vadd.f32 %v205_v4, %v198_v24  ;;  %v185_v22 = vadd.f32 %v2621_v47, %v149_v2  ;;  %v305_v61 = vrot.slane %v1685_v25, %v3043_v32  ;;  %v419_v25 = vstv %s3070_s8 }
 0x17d   :  { %v182_v53 = vmul.f32 %v3058_v14, %v175_v28  ;;  %v192_v60 = vpop.permute.xlu1 %191  ;;  %v3067_v14 = vstv %s1989_s24 }
 0x17e   :  { %v209_v42 = vmul.f32 0.2, %v207_v31  ;;  %v199_v10 = vadd.f32 %v197_v41, %v192_v60  ;;  %v277_v41 = vmul.f32 %v2034_v40, %v3062_v23 }
 0x17f   :  { %v184_v33 = vadd.f32 %v182_v53, %v148_v46 }
 0x180   :  { %v211_v5 = vmax.f32 %v207_v31, %v209_v42  ;;  %v208_v17 = vadd.f32 %v206_v51, %v199_v10 }
 0x182   :  { %v218_v27 = vmul.f32 %v216_v6, %v211_v5  ;;  %v210_v8 = vmul.f32 0.2, %v208_v17  ;;  %v228_v57 = vpop.permute.xlu1 %227 }
 0x183   :  { %v235_v47 = vadd.f32 %v2218_v30, %v228_v57  ;;  %v3069_v57 = vstv %s3066_s20 }
 0x184   :  { %v220_v9 = vadd.f32 %v218_v27, %v184_v33  ;;  %v212_v12 = vmax.f32 %v208_v17, %v210_v8  ;;  %v324_v17 = vstv %s3065_s21  ;;  %v350_v20 = vmul.f32 %v2044_v44, %v3069_v57 }
 0x185   :  { %v244_v38 = vadd.f32 %v242_v45, %v235_v47 }
 0x186   :  { %v219_v15 = vmul.f32 %v216_v6, %v212_v12  ;;  %v256_v46 = vadd.f32 %v2644_v62, %v220_v9  ;;  %v311_v62 = vstv %s3061_s18 }
 0x187   :  { %v246_v0 = vmul.f32 0.2, %v244_v38  ;;  %v260_v52 = vpop.permute.xlu1 %259  ;;  %v313_v2 = vmul.f32 %v2034_v40, %v311_v62  ;;  %v314_v32 = vmul.f32 %v2044_v44, %v311_v62  ;;  %v3073_v62 = vstv %s1999_s28  ;;  %s3077_s28 = sld [smem:[#allocation15_spill]] }
 0x188   :  { %v221_v21 = vadd.f32 %v219_v15, %v185_v22  ;;  %v270_v30 = vadd.f32 %v2251_v35, %v260_v52 }
 0x189   :  { %v248_v43 = vmax.f32 %v244_v38, %v246_v0  ;;  %v3071_v0 = vstv %s3068_s22 }
 0x18a   :  { %v279_v37 = vadd.f32 %v277_v41, %v270_v30  ;;  %v385_v52 = vmul.f32 %v2034_v40, %v3071_v0  ;;  %v3072_v30 = vld [vmem:[#allocation19_spill] sm:$0xff] }
 0x18b   :  { %v255_v19 = vmul.f32 %v3064_v49, %v248_v43  ;;  %v3081_v0 = vld [vmem:[#allocation23_spill] sm:$0xff] }
 0x18c   :  { %v281_v4 = vmul.f32 0.2, %v279_v37  ;;  %v296_v63 = vpop.permute.xlu1 %295 }
 0x18d   :  { %v257_v24 = vadd.f32 %v255_v19, %v221_v21  ;;  %v306_v28 = vadd.f32 %v305_v61, %v296_v63  ;;  %v421_v19 = vmul.f32 %v2034_v40, %v419_v25 }
 0x18e   :  { %v283_v35 = vmax.f32 %v279_v37, %v281_v4 }
 0x18f   :  { %v315_v31 = vadd.f32 %v313_v2, %v306_v28  ;;  %v293_v22 = vadd.f32 %v2658_v36, %v257_v24  ;;  %v3076_v28 = vstv %s2005_s30  ;;  %s3083_s30 = sld [smem:[#allocation17_spill]] }
 0x190   :  { %v290_v53 = vmul.f32 %v3067_v14, %v283_v35  ;;  %v300_v60 = vpop.permute.xlu1 %299 }
 0x191   :  { %v317_v51 = vmul.f32 0.2, %v315_v31  ;;  %v307_v42 = vadd.f32 %v305_v61, %v300_v60 }
 0x192   :  { %v292_v10 = vadd.f32 %v290_v53, %v256_v46 }
 0x193   :  { %v319_v33 = vmax.f32 %v315_v31, %v317_v51  ;;  %v316_v5 = vadd.f32 %v314_v32, %v307_v42  ;;  %v432_v42 = vstv %s3074_s0 }
 0x195   :  { %v326_v6 = vmul.f32 %v324_v17, %v319_v33  ;;  %v318_v27 = vmul.f32 0.2, %v316_v5  ;;  %v336_v8 = vpop.permute.xlu1 %335 }
 0x196   :  { %v343_v36 = vadd.f32 %v3019_v26, %v336_v8  ;;  %v1686_v26 = vld [vmem:[%s3063_s6 + $0x8] sm:$0xff] }
 0x197   :  { %v328_v45 = vadd.f32 %v326_v6, %v292_v10  ;;  %v320_v47 = vmax.f32 %v316_v5, %v318_v27  ;;  %v413_v43 = vrot.slane %v1686_v26, %v3072_v30 }
 0x198   :  { %v352_v9 = vadd.f32 %v350_v20, %v343_v36 }
 0x199   :  { %v327_v12 = vmul.f32 %v324_v17, %v320_v47  ;;  %v364_v38 = vadd.f32 %v2680_v13, %v328_v45  ;;  %v3079_v17 = vstv %s3075_s26 }
 0x19a   :  { %v354_v15 = vmul.f32 0.2, %v352_v9  ;;  %v368_v46 = vpop.permute.xlu1 %367  ;;  %v458_v6 = vmul.f32 %v2044_v44, %v3079_v17 }
 0x19b   :  { %v329_v23 = vadd.f32 %v327_v12, %v293_v22  ;;  %v378_v41 = vadd.f32 %v3027_v29, %v368_v46  ;;  %v422_v22 = vmul.f32 %v2044_v44, %v419_v25 }
 0x19c   :  { %v356_v21 = vmax.f32 %v352_v9, %v354_v15  ;;  %v3080_v9 = vstv %s3077_s28 }
 0x19d   :  { %v387_v61 = vadd.f32 %v385_v52, %v378_v41  ;;  %v493_v12 = vmul.f32 %v2034_v40, %v3080_v9  ;;  %v521_v52 = vrot.slane %v1686_v26, %v3081_v0  ;;  %v3082_v41 = vstv %s2018_s14  ;;  %s1775_s14 = smov 16  }
 0x19e   :  { %v363_v13 = vmul.f32 %v3073_v62, %v356_v21 }
 0x19f   :  { %v389_v37 = vmul.f32 0.2, %v387_v61  ;;  %v404_v49 = vpop.permute.xlu1 %403 }
 0x1a0   :  { %v365_v4 = vadd.f32 %v363_v13, %v329_v23  ;;  %v414_v63 = vadd.f32 %v413_v43, %v404_v49  ;;  %v527_v23 = vstv %s3078_s27 }
 0x1a1   :  { %v391_v29 = vmax.f32 %v387_v61, %v389_v37  ;;  %v530_v26 = vmul.f32 %v2044_v44, %v527_v23 }
 0x1a2   :  { %v423_v2 = vadd.f32 %v421_v19, %v414_v63  ;;  %v401_v24 = vadd.f32 %v2703_v11, %v365_v4 }
 0x1a3   :  { %v398_v35 = vmul.f32 %v3076_v28, %v391_v29  ;;  %v408_v31 = vpop.permute.xlu1 %407  ;;  %v540_v28 = vstv %s3083_s30 }
 0x1a4   :  { %v425_v14 = vmul.f32 0.2, %v423_v2  ;;  %v415_v53 = vadd.f32 %v413_v43, %v408_v31 }
 0x1a5   :  { %v400_v60 = vadd.f32 %v398_v35, %v364_v38 }
 0x1a6   :  { %v427_v32 = vmax.f32 %v423_v2, %v425_v14  ;;  %v424_v51 = vadd.f32 %v422_v22, %v415_v53  ;;  %v3084_v14 = vstv %s2046_s5 }
 0x1a7   :  { %v566_v53 = vmul.f32 %v2044_v44, %v3084_v14 }
 0x1a8   :  { %v434_v10 = vmul.f32 %v432_v42, %v427_v32  ;;  %v426_v33 = vmul.f32 0.2, %v424_v51  ;;  %v444_v5 = vpop.permute.xlu1 %443 }
 0x1a9   :  { %v451_v11 = vadd.f32 %v3031_v3, %v444_v5  ;;  %v601_v5 = vmul.f32 %v2034_v40, %v599_v16 }
 0x1aa   :  { %v436_v27 = vadd.f32 %v434_v10, %v400_v60  ;;  %v428_v8 = vmax.f32 %v424_v51, %v426_v33 }
 0x1ab   :  { %v460_v57 = vadd.f32 %v458_v6, %v451_v11 }
 0x1ac   :  { %v435_v20 = vmul.f32 %v432_v42, %v428_v8  ;;  %v472_v36 = vadd.f32 %v2721_v50, %v436_v27  ;;  %v529_v50 = vmul.f32 %v2034_v40, %v527_v23 }
 0x1ad   :  { %v462_v45 = vmul.f32 0.2, %v460_v57  ;;  %v476_v47 = vpop.permute.xlu1 %475 }
 0x1ae   :  { %v437_v38 = vadd.f32 %v435_v20, %v401_v24  ;;  %v486_v15 = vadd.f32 %v3035_v48, %v476_v47 }
 0x1af   :  { %v464_v46 = vmax.f32 %v460_v57, %v462_v45 }
 0x1b0   :  { %v495_v3 = vadd.f32 %v493_v12, %v486_v15 }
 0x1b1   :  { %v471_v21 = vmul.f32 %v3082_v41, %v464_v46 }
 0x1b2   :  { %v497_v43 = vmul.f32 0.2, %v495_v3  ;;  %v512_v25 = vpop.permute.xlu1 %511 }
 0x1b3   :  { %v473_v61 = vadd.f32 %v471_v21, %v437_v38  ;;  %v522_v62 = vadd.f32 %v521_v52, %v512_v25 }
 0x1b4   :  { %v499_v13 = vmax.f32 %v495_v3, %v497_v43 }
 0x1b5   :  { %v531_v37 = vadd.f32 %v529_v50, %v522_v62  ;;  %v509_v49 = vadd.f32 %v2741_v1, %v473_v61 }
 0x1b6   :  { %v506_v48 = vmul.f32 %v504_v56, %v499_v13  ;;  %v516_v19 = vpop.permute.xlu1 %515 }
 0x1b7   :  { %v533_v4 = vmul.f32 0.2, %v531_v37  ;;  %v523_v63 = vadd.f32 %v521_v52, %v516_v19 }
 0x1b8   :  { %v508_v29 = vadd.f32 %v506_v48, %v472_v36 }
 0x1b9   :  { %v535_v2 = vmax.f32 %v531_v37, %v533_v4  ;;  %v532_v24 = vadd.f32 %v530_v26, %v523_v63 }
 0x1bb   :  { %v542_v35 = vmul.f32 %v540_v28, %v535_v2  ;;  %v534_v31 = vmul.f32 0.2, %v532_v24  ;;  %v552_v22 = vpop.permute.xlu1 %551 }
 0x1bc   :  { %v559_v1 = vadd.f32 %v3040_v58, %v552_v22 }
 0x1bd   :  { %v536_v56 = vmax.f32 %v532_v24, %v534_v31  ;;  %v544_v60 = vadd.f32 %v542_v35, %v508_v29 }
 0x1be   :  { %v568_v32 = vadd.f32 %v566_v53, %v559_v1  ;;  %v1687_v53 = vld [vmem:[%s3085_s3] sm:$0x7] }
 0x1bf   :  { %v543_v51 = vmul.f32 %v540_v28, %v536_v56  ;;  %v580_v42 = vadd.f32 %v2762_v34, %v544_v60  ;;  %v1351_v1 = vrot.slane %v1687_v53, %v3072_v30 }
 0x1c0   :  { %v570_v10 = vmul.f32 0.2, %v568_v32  ;;  %v584_v33 = vpop.permute.xlu1 %583 }
 0x1c1   :  { %v594_v17 = vadd.f32 %v2733_v55, %v584_v33  ;;  %v545_v6 = vadd.f32 %v543_v51, %v509_v49 }
 0x1c2   :  { %v572_v11 = vmax.f32 %v568_v32, %v570_v10 }
 0x1c3   :  { %v603_v27 = vadd.f32 %v601_v5, %v594_v17 }
 0x1c4   :  { %v579_v44 = vmul.f32 %v576_v18, %v572_v11 }
 0x1c5   :  { %v605_v58 = vmul.f32 0.2, %v603_v27 }
 0x1c6   :  { %v581_v8 = vadd.f32 %v579_v44, %v545_v6 }
 0x1c7   :  { %v607_v57 = vmax.f32 %v603_v27, %v605_v58 }
 0x1c8   :  { %v617_v20 = vadd.f32 %v2772_v7, %v581_v8 }
 0x1c9   :  { %v614_v36 = vmul.f32 %v612_v54, %v607_v57 }
 0x1ca   :  { %v622_v40 = vsel %vm618_vm0, %v617_v20, -inf }
 0x1cb   :  { %v616_v34 = vadd.f32 %v614_v36, %v580_v42 }
 0x1cd   :  { %v619_v45 = vsel %vm618_vm0, %v616_v34, -inf }
 0x1ce   :  { %620 = vmax.xlane.f32.xlu0 %v619_v45 }
 0x1d2   :  { %623 = vmax.xlane.f32.xlu0 %v622_v40 }
 0x1f3   :  { %v1270_v55 = vpop.xlane.xlu1 %1269 }
 0x1f4   :  { %v1274_v16 = vsub.f32 %v2737_v39, %v1270_v55  ;;  %v1273_v47 = vpop.xlane.xlu0 %1272 }
 0x1f5   :  { %v1275_v18 = vsub.f32 %v2750_v59, %v1273_v47 }
 0x1f6   :  { %v1276_v9 = vmul.f32 1.442695, %v1274_v16 }
 0x1f7   :  { %v1278_v12 = vmul.f32 1.442695, %v1275_v18  ;;  %v1290_v38 = vpop.permute.xlu1 %1289 }
 0x1f8   :  { %1667 = vpow2.f32 %v1276_v9  ;;  %1409 = vmatpush3.bf16.msra.mxu1 %v1290_v38 }
 0x1f9   :  { %1669 = vpow2.f32 %v1278_v12 }
 0x205   :  { %v1668_v54 = vpop.eup %1667 }
 0x206   :  { %v1670_v7 = vpop.eup %1669  ;;  %v1280_v15 = vsel %vm618_vm0, %v1668_v54, 0.0 }
 0x207   :  { %1281 = vadd.xlane.f32.xlu0 %v1280_v15  ;;  %v1288_v46 = vpack.c.bf16 %v1670_v7, %v1668_v54  ;;  %v1283_v0 = vsel %vm618_vm0, %v1670_v7, 0.0 }
 0x209   :  { %1411 = vmatmul.mubr.msk.bf16.vlgmr.msra.gmra.mxu1 %vm618_vm0, %v1288_v46 }
 0x20b   :  { %1284 = vadd.xlane.f32.xlu0 %v1283_v0 }
 0x257   :  { %v621_v39 = vpop.xlane.xlu0 %620 }
 0x258   :  { %v625_v52 = vsub.f32 %v616_v34, %v621_v39 }
 0x25a   :  { %v627_v59 = vmul.f32 1.442695, %v625_v52 }
 0x25b   :  { %v624_v23 = vpop.xlane.xlu0 %623 }
 0x25c   :  { %1671 = vpow2.f32 %v627_v59  ;;  %v626_v3 = vsub.f32 %v617_v20, %v624_v23 }
 0x25e   :  { %v629_v41 = vmul.f32 1.442695, %v626_v3 }
 0x260   :  { %1673 = vpow2.f32 %v629_v41 }
 0x269   :  { %v1672_v21 = vpop.eup %1671 }
 0x26a   :  { %v631_v43 = vsel %vm618_vm0, %v1672_v21, 0.0 }
 0x26b   :  { %632 = vadd.xlane.f32.xlu1 %v631_v43 }
 0x26d   :  { %v1674_v25 = vpop.eup %1673 }
 0x26e   :  { %v634_v50 = vsel %vm618_vm0, %v1674_v25, 0.0  ;;  %v639_v61 = vpack.c.bf16 %v1674_v25, %v1672_v21 }
 0x26f   :  { %635 = vadd.xlane.f32.xlu0 %v634_v50 }
 0x270   :  { %1405 = vmatmul.mubr.msk.bf16.vlgmr.msra.gmra.mxu0 %vm618_vm0, %v639_v61 }
 0x290   :  { %v1282_v62 = vpop.xlane.xlu0 %1281 }
 0x291   :  { %1675 = vrcp.f32 %v1282_v62 }
 0x294   :  { %v1285_v13 = vpop.xlane.xlu0 %1284 }
 0x295   :  { %1677 = vrcp.f32 %v1285_v13 }
 0x29e   :  { %v1676_v37 = vpop.eup %1675 }
 0x2a2   :  { %v1678_v26 = vpop.eup %1677 }
 0x2c9   :  { %v1329_v49 = vpop.f32.mrf.mxu1 }
 0x2ca   :  { %v1336_v48 = vmul.f32 %v1676_v37, %v1329_v49 }
 0x2cb   :  { %v1412_v19 = vpop.f32.mrf.mxu1 }
 0x2cc   :  { %1340 = vrot.lane.b32.xlu0 %v1336_v48, %s1775_s14 }
 0x2cd   :  { %v1332_v4 = vpop.f32.mrf.mxu1 }
 0x2ce   :  { %v1337_v63 = vmul.f32 %v1678_v26, %v1332_v4 }
 0x2cf   :  { %v1413_v29 = vpop.f32.mrf.mxu1 }
 0x2d0   :  { %1342 = vrot.lane.b32.xlu0 %v1337_v63, %s1775_s14 }
 0x2f4   :  { %v633_v2 = vpop.xlane.xlu1 %632 }
 0x2f5   :  { %1679 = vrcp.f32 %v633_v2 }
 0x2f8   :  { %v636_v24 = vpop.xlane.xlu0 %635 }
 0x2f9   :  { %1681 = vrcp.f32 %v636_v24 }
 0x302   :  { %v1680_v14 = vpop.eup %1679 }
 0x306   :  { %v1682_v51 = vpop.eup %1681 }
 0x330   :  { %v683_v28 = vpop.f32.mrf.mxu0 }
 0x331   :  { %v690_v56 = vmul.f32 %v1680_v14, %v683_v28 }
 0x332   :  { %v1406_v35 = vpop.f32.mrf.mxu0 }
 0x334   :  { %v686_v31 = vpop.f32.mrf.mxu0 }
 0x335   :  { %v691_v10 = vmul.f32 %v1682_v51, %v686_v31 }
 0x336   :  { %v1407_v22 = vpop.f32.mrf.mxu0 }
 0x33e   :  { %v1341_v60 = vpop.permute.xlu0 %1340 }
 0x33f   :  { %v1346_v32 = vsel %vm618_vm0, %v690_v56, %v1341_v60 }
 0x340   :  { %v1352_v42 = vadd.f32 %v1351_v1, %v1346_v32 }
 0x342   :  { %v1354_v33 = vmax.f32 %v1352_v42, 0.0  ;;  %v1343_v5 = vpop.permute.xlu0 %1342 }
 0x343   :  { %v1347_v17 = vsel %vm618_vm0, %v691_v10, %v1343_v5 }
 0x344   :  { %v1388_v6 = vpack.c.bf16 %v1354_v33, %v1354_v33  ;;  %v1353_v11 = vadd.f32 %v1351_v1, %v1347_v17 }
 0x346   :  { %1365 = vst.msk [vmem:[#allocation2] sm:$0xf] %vm1364_vm2, %v1388_v6  ;;  %v1355_v27 = vmax.f32 %v1353_v11, 0.0 }
 0x348   :  { %v1389_v44 = vpack.c.bf16 %v1355_v27, %v1355_v27 }
 0x34a   :  { %1366 = vst.msk [vmem:[#allocation2 + $0x4] sm:$0xf] %vm1364_vm2, %v1389_v44 }
 0x34b   :  { %1699 = shalt.err (!%p1696_p4)
}
 0x34c   :  { %s1777_s2 = smov 64   ;;  %s1778_s1 = smov 4  }
 0x34d   :  { %s3086_s13 = sld [smem:[#allocation45_spill]] }
 0x353   :  { %1378 = dma.vmem_to_hbm [thread:$0]  %s1373_s4, 128, %s3086_s13, [#allocation3], %s1777_s2, %s1777_s2, %s1778_s1  }
 0x354   :  { %1708 = dma.done.wait [#allocation3], 128  }
 0x355   :  { %1709 = vsyncadd [#allocation3], 4294967168 }
 0x356   :  { %1382 = vsyncpa [#allocation3], 1 }

</bundles_post_ra>
